<compile_context>
chip_gen: v5e
topology: v5e:2x2
jax: 0.10.0
libtpu: 0.0.40
codegen_flags: <defaults>
</compile_context>

<pallas_src>
import functools

import jax
import jax.numpy as jnp
from jax.experimental import pallas as pl
from jax.experimental.pallas import tpu as pltpu

_LANE = 128


def _layer_norm(v, w, b, eps=1e-5):
    mu = jnp.mean(v, axis=-1, keepdims=True)
    var = jnp.mean((v - mu) ** 2, axis=-1, keepdims=True)
    return (v - mu) * jax.lax.rsqrt(var + eps) * w + b


def fft_block_kernel(
    x_ref,
    wqkvT_ref, woT_ref,
    ln1_w_ref, ln1_b_ref, ln2_w_ref, ln2_b_ref,
    w1T_ref, b1_ref, w2T_ref, b2_ref,
    out_ref, attn_ref,
    qkv_ref, ctx_ref,             # VMEM scratch, bf16
    *, n_head,
):
    x = x_ref[0]                  # (L, D) f32
    L, D = x.shape
    Dp = woT_ref.shape[0]         # padded attention width = n_head * hdp
    hdp = Dp // n_head            # per-head width, multiple of 128 (lane-aligned)
    inv_h = 1.0 / n_head

    # ---- residual 1 + LayerNorm 1 (f32 elementwise) ----
    residual = x
    xn = _layer_norm(x, ln1_w_ref[...], ln1_b_ref[...])

    # ---- fused QKV projection (attention scale pre-folded into Q columns). ----
    # Written straight into a bf16 VMEM scratch so the f32 (L, 3*Dp) intermediate
    # does not stay live across the head loop.
    qkv_ref[...] = jnp.dot(
        xn.astype(jnp.bfloat16), wqkvT_ref[...],
        preferred_element_type=jnp.float32).astype(jnp.bfloat16)

    # ---- per-head attention, streamed through lane-aligned scratch slices ----
    # hdp is a multiple of 128, so all per-head slices / stores are lane-dense.
    # Per-head temporaries are loaded from / stored to refs each iteration, so
    # they do not stay live across the (static) head loop.
    # TODO(synk): for n_head >= 8 switch to lax.fori_loop(unroll=True) over a
    #             head-major 3D scratch to also bound code size.
    for h in range(n_head):
        q0 = h * hdp
        k0 = Dp + h * hdp
        v0 = 2 * Dp + h * hdp
        qh = qkv_ref[:, q0:q0 + hdp]          # (L, hdp) bf16
        kh = qkv_ref[:, k0:k0 + hdp]
        vh = qkv_ref[:, v0:v0 + hdp]
        # scores = qh @ kh^T; K = hdp (>=128) -> full MXU fill, f32 accumulate.
        s = jax.lax.dot_general(
            qh, kh, (((1,), (1,)), ((), ())),
            preferred_element_type=jnp.float32)            # (L, L) f32
        s = s - jnp.max(s, axis=-1, keepdims=True)
        p = jnp.exp(s)
        # approx reciprocal (EUP slot): rows sum to 1 +/- ~1e-3 (within tolerance).
        p = p * pl.reciprocal(jnp.sum(p, axis=-1, keepdims=True), approx=True)
        # head-sum of attention maps; single 1/n_head scale applied after the loop.
        if h == 0:
            attn_ref[0] = p
        else:
            attn_ref[0] += p
        ctx_h = jnp.dot(p.astype(jnp.bfloat16), vh,
                        preferred_element_type=jnp.float32)  # (L, hdp) f32
        ctx_ref[:, q0:q0 + hdp] = ctx_h.astype(jnp.bfloat16)  # lane-dense store

    attn_ref[0] *= inv_h          # average_attn_weights=True

    # ---- single output projection over the full padded width ----
    # (padded ctx columns are zero AND the matching woT rows are zero).
    # ctx is bf16 here -- extra precision loss vs the f32 reference, within tolerance.
    attn_out = jnp.dot(ctx_ref[...], woT_ref[...],
                       preferred_element_type=jnp.float32)   # (L, D) f32

    x1 = residual + attn_out      # attention dropout = identity (eval)

    # ---- residual 2 + LayerNorm 2 + feed-forward (bf16 MXU, f32 accumulate) ----
    xn2 = _layer_norm(x1, ln2_w_ref[...], ln2_b_ref[...])
    h1 = jnp.dot(xn2.astype(jnp.bfloat16), w1T_ref[...],
                 preferred_element_type=jnp.float32) + b1_ref[...]
    h1 = jnp.maximum(h1, 0.0)
    ff = jnp.dot(h1.astype(jnp.bfloat16), w2T_ref[...],
                 preferred_element_type=jnp.float32) + b2_ref[...]

    out_ref[0] = x1 + ff          # FFN dropout = identity (eval)


def prepare_fft_block_weights(params, n_head):
    """One-time host-side prep (outside the hot path).

    * transposes weights for the x @ W^T layout,
    * folds the 1/sqrt(head_dim) attention scale into the Q columns,
    * zero-pads each head's width up to hdp (multiple of 128 lanes) so every
      per-head slice / store in the kernel is lane-dense and attention matmuls
      contract over >=128 elements,
    * casts all MXU operands to bf16.
    """
    D = params["wq"].shape[0]
    assert D % n_head == 0, "d_model must be divisible by n_head"
    hd = D // n_head
    hdp = ((hd + _LANE - 1) // _LANE) * _LANE
    Dp = n_head * hdp
    d_inner = params["w1"].shape[0]
    scale = 1.0 / (hd ** 0.5)

    def head_pad_cols(w, col_scale=1.0):
        # w: (D, D) torch Linear weight used as x @ w.T; group output columns
        # head-major and zero-pad each head's hd columns up to hdp.
        wT = (w.T * col_scale).reshape(D, n_head, hd)
        wT = jnp.pad(wT, ((0, 0), (0, 0), (0, hdp - hd)))
        return wT.reshape(D, Dp)

    wqkvT = jnp.concatenate(
        [head_pad_cols(params["wq"], scale),
         head_pad_cols(params["wk"]),
         head_pad_cols(params["wv"])], axis=1).astype(jnp.bfloat16)   # (D, 3*Dp)

    # out-projection: ctx columns are head-major (head, hdp); pad matching rows with zeros.
    woT = params["wo"].T.reshape(n_head, hd, D)
    woT = jnp.pad(woT, ((0, 0), (0, hdp - hd), (0, 0)))
    woT = woT.reshape(Dp, D).astype(jnp.bfloat16)                     # (Dp, D)

    return dict(
        wqkvT=wqkvT,
        woT=woT,
        w1T=params["w1"].T.astype(jnp.bfloat16),                      # (D, d_inner)
        w2T=params["w2"].T.astype(jnp.bfloat16),                      # (d_inner, D)
        ln1_w=params["ln1_w"].reshape(1, D).astype(jnp.float32),
        ln1_b=params["ln1_b"].reshape(1, D).astype(jnp.float32),
        ln2_w=params["ln2_w"].reshape(1, D).astype(jnp.float32),
        ln2_b=params["ln2_b"].reshape(1, D).astype(jnp.float32),
        b1=params["b1"].reshape(1, d_inner).astype(jnp.float32),
        b2=params["b2"].reshape(1, D).astype(jnp.float32),
    )


def _vmem_limit_bytes(L, D, Dp, d_inner):
    bf16, f32 = 2, 4
    # auto-pipelined operands (double-buffered by the Pallas pipeline)
    weights = bf16 * (D * 3 * Dp + Dp * D + D * d_inner + d_inner * D)
    small = f32 * (5 * D + d_inner)
    blocks = f32 * (L * D + L * D + L * L)            # x / out / attn blocks
    pipelined = 2 * (weights + small + blocks)
    # kernel-managed VMEM scratch (single copy)
    scratch = bf16 * (L * 3 * Dp + L * Dp)
    # compiler-internal temporaries: f32 QKV matmul result, per-head (L,L) s/p,
    # (L, d_inner) FFN hidden, LN/residual temps; plus general headroom.
    temps = f32 * (L * 3 * Dp + 2 * L * L + L * d_inner + 6 * L * D)
    need = pipelined + scratch + temps + (4 << 20)
    try:
        phys = pltpu.get_tpu_info().vmem_capacity_bytes   # 128 MiB v5e/v6e, 64 MiB v7x
    except Exception:
        phys = 128 * 1024 * 1024
    cap = (phys * 3) // 4     # ~96 MiB on v5e/v6e, ~48 MiB on v7x (headroom for compiler)
    return int(max(16 << 20, min(cap, need)))


def fft_block(x, w, n_head):
    """x: (B, L, D) f32; w: output of prepare_fft_block_weights(); returns (out, attn_map)."""
    B, L, D = x.shape
    Dp, D2 = w["woT"].shape
    assert D2 == D and Dp % n_head == 0
    d_inner = w["w1T"].shape[1]

    full = lambda shape: pl.BlockSpec(shape, lambda b: (0, 0))

    kernel = functools.partial(fft_block_kernel, n_head=n_head)
    out, attn = pl.pallas_call(
        kernel,
        out_shape=(
            jax.ShapeDtypeStruct((B, L, D), jnp.float32),
            # attention map kept f32 to match the torch module.
            # TODO(synk): emit bf16 if the consumer tolerates it (halves the
            #             (B, L, L) HBM writeback at large L).
            jax.ShapeDtypeStruct((B, L, L), jnp.float32),
        ),
        grid_spec=pltpu.PrefetchScalarGridSpec(
            num_scalar_prefetch=0,
            grid=(B,),
            in_specs=[
                pl.BlockSpec((1, L, D), lambda b: (b, 0, 0)),   # x
                full((D, 3 * Dp)),                              # fused+padded QKV weight
                full((Dp, D)),                                  # padded out-projection
                full((1, D)), full((1, D)),                     # ln1 w, b
                full((1, D)), full((1, D)),                     # ln2 w, b
                full((D, d_inner)), full((1, d_inner)),         # w1T, b1
                full((d_inner, D)), full((1, D)),               # w2T, b2
            ],
            out_specs=[
                pl.BlockSpec((1, L, D), lambda b: (b, 0, 0)),
                pl.BlockSpec((1, L, L), lambda b: (b, 0, 0)),
            ],
            scratch_shapes=[
                pltpu.VMEM((L, 3 * Dp), jnp.bfloat16),   # QKV (head-padded, bf16)
                pltpu.VMEM((L, Dp), jnp.bfloat16),       # per-head context
            ],
        ),
        compiler_params=pltpu.CompilerParams(
            dimension_semantics=("parallel",),
            vmem_limit_bytes=_vmem_limit_bytes(L, D, Dp, d_inner)),
    )(x, w["wqkvT"], w["woT"],
      w["ln1_w"], w["ln1_b"], w["ln2_w"], w["ln2_b"],
      w["w1T"], w["b1"], w["w2T"], w["b2"])
    return out, attn


def fft_block_reference(x, p, n_head):
    """Pure-JAX f32 reference mirroring the PyTorch module (eval mode)."""
    def ln(v, w, b):
        mu = v.mean(-1, keepdims=True)
        var = ((v - mu) ** 2).mean(-1, keepdims=True)
        return (v - mu) / jnp.sqrt(var + 1e-5) * w + b

    B, L, D = x.shape
    hd = D // n_head
    residual = x
    xn = ln(x, p["ln1_w"], p["ln1_b"])
    q = xn @ p["wq"].T
    k = xn @ p["wk"].T
    v = xn @ p["wv"].T
    q = q.reshape(B, L, n_head, hd).transpose(0, 2, 1, 3)
    k = k.reshape(B, L, n_head, hd).transpose(0, 2, 1, 3)
    v = v.reshape(B, L, n_head, hd).transpose(0, 2, 1, 3)
    s = (q @ k.transpose(0, 1, 3, 2)) / jnp.sqrt(hd).astype(jnp.float32)
    pmat = jax.nn.softmax(s, axis=-1)
    ctx = (pmat @ v).transpose(0, 2, 1, 3).reshape(B, L, D)
    attn_out = ctx @ p["wo"].T
    attn_map = pmat.mean(axis=1)
    x1 = residual + attn_out
    xn2 = ln(x1, p["ln2_w"], p["ln2_b"])
    ff = jnp.maximum(xn2 @ p["w1"].T + p["b1"], 0.0) @ p["w2"].T + p["b2"]
    return x1 + ff, attn_map


def init_params(key, d_model, d_inner):
    ks = jax.random.split(key, 8)
    scale = 0.1
    return {
        "wq": scale * jax.random.normal(ks[0], (d_model, d_model), jnp.float32),
        "wk": scale * jax.random.normal(ks[1], (d_model, d_model), jnp.float32),
        "wv": scale * jax.random.normal(ks[2], (d_model, d_model), jnp.float32),
        "wo": scale * jax.random.normal(ks[3], (d_model, d_model), jnp.float32),
        "w1": scale * jax.random.normal(ks[4], (d_inner, d_model), jnp.float32),
        "b1": scale * jax.random.normal(ks[5], (d_inner,), jnp.float32),
        "w2": scale * jax.random.normal(ks[6], (d_model, d_inner), jnp.float32),
        "b2": scale * jax.random.normal(ks[7], (d_model,), jnp.float32),
        "ln1_w": jnp.ones((d_model,), jnp.float32),
        "ln1_b": jnp.zeros((d_model,), jnp.float32),
        "ln2_w": jnp.ones((d_model,), jnp.float32),
        "ln2_b": jnp.zeros((d_model,), jnp.float32),
    }


if __name__ == "__main__":
    B, L, d_model, d_inner, n_head = 2, 8, 32, 64, 4

    key = jax.random.PRNGKey(0)
    kx, kp = jax.random.split(key)
    x = jax.random.normal(kx, (B, L, d_model), jnp.float32)
    params = init_params(kp, d_model, d_inner)

    # one-time weight prep (outside the hot path)
    prepped = jax.tree_util.tree_map(jax.block_until_ready,
                                     prepare_fft_block_weights(params, n_head))

    out, attn = fft_block(x, prepped, n_head)
    out = jax.block_until_ready(out)
    attn = jax.block_until_ready(attn)

    out_ref, attn_ref = fft_block_reference(x, params, n_head)
    # bf16 MXU operands + approx softmax reciprocal vs f32 reference -> loosened tolerance
    assert jnp.allclose(out, out_ref, atol=2e-2, rtol=2e-2), "output mismatch"
    assert jnp.allclose(attn, attn_ref, atol=1e-2, rtol=1e-2), "attention-map mismatch"

    print("KERNEL_OK")
</pallas_src>

<mosaic_0001>
module attributes {stable_mosaic.version = 11 : i64} {
  func.func @fft_block_kernel(%arg0: i32, %arg1: memref<1x8x32xf32, #tpu.memory_space<vmem>>, %arg2: memref<32x1536xbf16, #tpu.memory_space<vmem>>, %arg3: memref<512x32xbf16, #tpu.memory_space<vmem>>, %arg4: memref<1x32xf32, #tpu.memory_space<vmem>>, %arg5: memref<1x32xf32, #tpu.memory_space<vmem>>, %arg6: memref<1x32xf32, #tpu.memory_space<vmem>>, %arg7: memref<1x32xf32, #tpu.memory_space<vmem>>, %arg8: memref<32x64xbf16, #tpu.memory_space<vmem>>, %arg9: memref<1x64xf32, #tpu.memory_space<vmem>>, %arg10: memref<64x32xbf16, #tpu.memory_space<vmem>>, %arg11: memref<1x32xf32, #tpu.memory_space<vmem>>, %arg12: memref<1x8x32xf32, #tpu.memory_space<vmem>>, %arg13: memref<1x8x8xf32, #tpu.memory_space<vmem>>, %arg14: memref<8x1536xbf16, #tpu.memory_space<vmem>>, %arg15: memref<8x512xbf16, #tpu.memory_space<vmem>>) attributes {dimension_semantics = [#tpu.dimension_semantics<parallel>], iteration_bounds = array<i64: 2>, scalar_prefetch = 0 : i64, scratch_operands = 2 : i64, tpu.core_type = #tpu.core_type<tc>, window_params = [{transform_indices = @transform_0, window_bounds = array<i64: 1, 8, 32>}, {pipeline_mode = #tpu.pipeline_mode<synchronous>, transform_indices = @transform_1, window_bounds = array<i64: 32, 1536>}, {pipeline_mode = #tpu.pipeline_mode<synchronous>, transform_indices = @transform_2, window_bounds = array<i64: 512, 32>}, {pipeline_mode = #tpu.pipeline_mode<synchronous>, transform_indices = @transform_3, window_bounds = array<i64: 1, 32>}, {pipeline_mode = #tpu.pipeline_mode<synchronous>, transform_indices = @transform_4, window_bounds = array<i64: 1, 32>}, {pipeline_mode = #tpu.pipeline_mode<synchronous>, transform_indices = @transform_5, window_bounds = array<i64: 1, 32>}, {pipeline_mode = #tpu.pipeline_mode<synchronous>, transform_indices = @transform_6, window_bounds = array<i64: 1, 32>}, {pipeline_mode = #tpu.pipeline_mode<synchronous>, transform_indices = @transform_7, window_bounds = array<i64: 32, 64>}, {pipeline_mode = #tpu.pipeline_mode<synchronous>, transform_indices = @transform_8, window_bounds = array<i64: 1, 64>}, {pipeline_mode = #tpu.pipeline_mode<synchronous>, transform_indices = @transform_9, window_bounds = array<i64: 64, 32>}, {pipeline_mode = #tpu.pipeline_mode<synchronous>, transform_indices = @transform_10, window_bounds = array<i64: 1, 32>}, {transform_indices = @transform_11, window_bounds = array<i64: 1, 8, 32>}, {transform_indices = @transform_12, window_bounds = array<i64: 1, 8, 8>}]} {
    %c0 = arith.constant 0 : index
    %c0_0 = arith.constant 0 : index
    %c0_1 = arith.constant 0 : index
    %0 = vector.load %arg1[%c0, %c0_0, %c0_1] : memref<1x8x32xf32, #tpu.memory_space<vmem>>, vector<1x8x32xf32>
    %1 = vector.shape_cast %0 : vector<1x8x32xf32> to vector<8x32xf32>
    %c0_2 = arith.constant 0 : index
    %c0_3 = arith.constant 0 : index
    %2 = vector.load %arg4[%c0_2, %c0_3] : memref<1x32xf32, #tpu.memory_space<vmem>>, vector<1x32xf32>
    %c0_4 = arith.constant 0 : index
    %c0_5 = arith.constant 0 : index
    %3 = vector.load %arg5[%c0_4, %c0_5] : memref<1x32xf32, #tpu.memory_space<vmem>>, vector<1x32xf32>
    %cst = arith.constant dense<0.000000e+00> : vector<8xf32>
    %4 = vector.multi_reduction <add>, %1, %cst [1] : vector<8x32xf32> to vector<8xf32>
    %5 = vector.shape_cast %4 : vector<8xf32> to vector<8x1xf32>
    %cst_6 = arith.constant 3.200000e+01 : f32
    %6 = vector.broadcast %cst_6 : f32 to vector<8x1xf32>
    %7 = arith.divf %5, %6 : vector<8x1xf32>
    %8 = vector.broadcast %7 : vector<8x1xf32> to vector<8x32xf32>
    %9 = arith.subf %1, %8 : vector<8x32xf32>
    %10 = arith.mulf %9, %9 : vector<8x32xf32>
    %cst_7 = arith.constant dense<0.000000e+00> : vector<8xf32>
    %11 = vector.multi_reduction <add>, %10, %cst_7 [1] : vector<8x32xf32> to vector<8xf32>
    %12 = vector.shape_cast %11 : vector<8xf32> to vector<8x1xf32>
    %cst_8 = arith.constant 3.200000e+01 : f32
    %13 = vector.broadcast %cst_8 : f32 to vector<8x1xf32>
    %14 = arith.divf %12, %13 : vector<8x1xf32>
    %15 = vector.broadcast %7 : vector<8x1xf32> to vector<8x32xf32>
    %16 = arith.subf %1, %15 : vector<8x32xf32>
    %cst_9 = arith.constant 9.99999974E-6 : f32
    %17 = vector.broadcast %cst_9 : f32 to vector<8x1xf32>
    %18 = arith.addf %14, %17 : vector<8x1xf32>
    %19 = math.rsqrt %18 : vector<8x1xf32>
    %20 = vector.broadcast %19 : vector<8x1xf32> to vector<8x32xf32>
    %21 = arith.mulf %16, %20 : vector<8x32xf32>
    %22 = vector.broadcast %2 : vector<1x32xf32> to vector<8x32xf32>
    %23 = arith.mulf %21, %22 : vector<8x32xf32>
    %24 = vector.broadcast %3 : vector<1x32xf32> to vector<8x32xf32>
    %25 = arith.addf %23, %24 : vector<8x32xf32>
    %26 = arith.truncf %25 : vector<8x32xf32> to vector<8x32xbf16>
    %c0_10 = arith.constant 0 : index
    %c0_11 = arith.constant 0 : index
    %27 = vector.load %arg2[%c0_10, %c0_11] : memref<32x1536xbf16, #tpu.memory_space<vmem>>, vector<32x1536xbf16>
    %cst_12 = arith.constant dense<0.000000e+00> : vector<8x1536xf32>
    %28 = tpu.matmul %26, %27, %cst_12 {dimension_numbers = #tpu.dot_dimension_numbers<[1], [0], [0], [1], [0, 0, 1, 1], [], []>} : vector<8x32xbf16>, vector<32x1536xbf16>, vector<8x1536xf32> -> vector<8x1536xf32>
    %29 = arith.truncf %28 : vector<8x1536xf32> to vector<8x1536xbf16>
    %c0_13 = arith.constant 0 : index
    %c0_14 = arith.constant 0 : index
    %30 = vector.load %arg14[%c0_13, %c0_14] : memref<8x1536xbf16, #tpu.memory_space<vmem>>, vector<8x1536xbf16>
    tpu.vector_store %arg14[%c0_13, %c0_14], %29 {strides = array<i32>} : memref<8x1536xbf16, #tpu.memory_space<vmem>>, vector<8x1536xbf16>,
    %c0_15 = arith.constant 0 : index
    %c0_16 = arith.constant 0 : index
    %31 = vector.load %arg14[%c0_15, %c0_16] : memref<8x1536xbf16, #tpu.memory_space<vmem>>, vector<8x128xbf16>
    %c0_17 = arith.constant 0 : index
    %c512 = arith.constant 512 : index
    %32 = vector.load %arg14[%c0_17, %c512] : memref<8x1536xbf16, #tpu.memory_space<vmem>>, vector<8x128xbf16>
    %c0_18 = arith.constant 0 : index
    %c1024 = arith.constant 1024 : index
    %33 = vector.load %arg14[%c0_18, %c1024] : memref<8x1536xbf16, #tpu.memory_space<vmem>>, vector<8x128xbf16>
    %cst_19 = arith.constant dense<0.000000e+00> : vector<8x8xf32>
    %34 = tpu.matmul %31, %32, %cst_19 {dimension_numbers = #tpu.dot_dimension_numbers<[1], [1], [0], [0], [0, 0, 1, 0], [], []>} : vector<8x128xbf16>, vector<8x128xbf16>, vector<8x8xf32> -> vector<8x8xf32>
    %cst_20 = arith.constant dense<0xFF800000> : vector<8xf32>
    %35 = vector.multi_reduction <maximumf>, %34, %cst_20 [1] : vector<8x8xf32> to vector<8xf32>
    %36 = vector.shape_cast %35 : vector<8xf32> to vector<8x1xf32>
    %37 = vector.broadcast %36 : vector<8x1xf32> to vector<8x8xf32>
    %38 = arith.subf %34, %37 : vector<8x8xf32>
    %39 = math.exp %38 : vector<8x8xf32>
    %cst_21 = arith.constant dense<0.000000e+00> : vector<8xf32>
    %40 = vector.multi_reduction <add>, %39, %cst_21 [1] : vector<8x8xf32> to vector<8xf32>
    %41 = vector.shape_cast %40 : vector<8xf32> to vector<8x1xf32>
    %42 = tpu.reciprocal %41 {approx = true} : vector<8x1xf32> -> vector<8x1xf32>
    %43 = vector.broadcast %42 : vector<8x1xf32> to vector<8x8xf32>
    %44 = arith.mulf %39, %43 : vector<8x8xf32>
    %c0_22 = arith.constant 0 : index
    %c0_23 = arith.constant 0 : index
    %c0_24 = arith.constant 0 : index
    %45 = vector.load %arg13[%c0_22, %c0_23, %c0_24] : memref<1x8x8xf32, #tpu.memory_space<vmem>>, vector<1x8x8xf32>
    %46 = vector.shape_cast %45 : vector<1x8x8xf32> to vector<8x8xf32>
    %47 = vector.shape_cast %44 : vector<8x8xf32> to vector<1x8x8xf32>
    tpu.vector_store %arg13[%c0_22, %c0_23, %c0_24], %47 {strides = array<i32>} : memref<1x8x8xf32, #tpu.memory_space<vmem>>, vector<1x8x8xf32>,
    %48 = arith.truncf %44 : vector<8x8xf32> to vector<8x8xbf16>
    %cst_25 = arith.constant dense<0.000000e+00> : vector<8x128xf32>
    %49 = tpu.matmul %48, %33, %cst_25 {dimension_numbers = #tpu.dot_dimension_numbers<[1], [0], [0], [1], [0, 0, 1, 1], [], []>} : vector<8x8xbf16>, vector<8x128xbf16>, vector<8x128xf32> -> vector<8x128xf32>
    %50 = arith.truncf %49 : vector<8x128xf32> to vector<8x128xbf16>
    %c0_26 = arith.constant 0 : index
    %c0_27 = arith.constant 0 : index
    %51 = vector.load %arg15[%c0_26, %c0_27] : memref<8x512xbf16, #tpu.memory_space<vmem>>, vector<8x128xbf16>
    tpu.vector_store %arg15[%c0_26, %c0_27], %50 {strides = array<i32>} : memref<8x512xbf16, #tpu.memory_space<vmem>>, vector<8x128xbf16>,
    %c0_28 = arith.constant 0 : index
    %c128 = arith.constant 128 : index
    %52 = vector.load %arg14[%c0_28, %c128] : memref<8x1536xbf16, #tpu.memory_space<vmem>>, vector<8x128xbf16>
    %c0_29 = arith.constant 0 : index
    %c640 = arith.constant 640 : index
    %53 = vector.load %arg14[%c0_29, %c640] : memref<8x1536xbf16, #tpu.memory_space<vmem>>, vector<8x128xbf16>
    %c0_30 = arith.constant 0 : index
    %c1152 = arith.constant 1152 : index
    %54 = vector.load %arg14[%c0_30, %c1152] : memref<8x1536xbf16, #tpu.memory_space<vmem>>, vector<8x128xbf16>
    %cst_31 = arith.constant dense<0.000000e+00> : vector<8x8xf32>
    %55 = tpu.matmul %52, %53, %cst_31 {dimension_numbers = #tpu.dot_dimension_numbers<[1], [1], [0], [0], [0, 0, 1, 0], [], []>} : vector<8x128xbf16>, vector<8x128xbf16>, vector<8x8xf32> -> vector<8x8xf32>
    %cst_32 = arith.constant dense<0xFF800000> : vector<8xf32>
    %56 = vector.multi_reduction <maximumf>, %55, %cst_32 [1] : vector<8x8xf32> to vector<8xf32>
    %57 = vector.shape_cast %56 : vector<8xf32> to vector<8x1xf32>
    %58 = vector.broadcast %57 : vector<8x1xf32> to vector<8x8xf32>
    %59 = arith.subf %55, %58 : vector<8x8xf32>
    %60 = math.exp %59 : vector<8x8xf32>
    %cst_33 = arith.constant dense<0.000000e+00> : vector<8xf32>
    %61 = vector.multi_reduction <add>, %60, %cst_33 [1] : vector<8x8xf32> to vector<8xf32>
    %62 = vector.shape_cast %61 : vector<8xf32> to vector<8x1xf32>
    %63 = tpu.reciprocal %62 {approx = true} : vector<8x1xf32> -> vector<8x1xf32>
    %64 = vector.broadcast %63 : vector<8x1xf32> to vector<8x8xf32>
    %65 = arith.mulf %60, %64 : vector<8x8xf32>
    %c0_34 = arith.constant 0 : index
    %c0_35 = arith.constant 0 : index
    %c0_36 = arith.constant 0 : index
    %66 = vector.load %arg13[%c0_34, %c0_35, %c0_36] : memref<1x8x8xf32, #tpu.memory_space<vmem>>, vector<1x8x8xf32>
    %67 = vector.shape_cast %66 : vector<1x8x8xf32> to vector<8x8xf32>
    %68 = arith.addf %67, %65 : vector<8x8xf32>
    %c0_37 = arith.constant 0 : index
    %c0_38 = arith.constant 0 : index
    %c0_39 = arith.constant 0 : index
    %69 = vector.load %arg13[%c0_37, %c0_38, %c0_39] : memref<1x8x8xf32, #tpu.memory_space<vmem>>, vector<1x8x8xf32>
    %70 = vector.shape_cast %69 : vector<1x8x8xf32> to vector<8x8xf32>
    %71 = vector.shape_cast %68 : vector<8x8xf32> to vector<1x8x8xf32>
    tpu.vector_store %arg13[%c0_37, %c0_38, %c0_39], %71 {strides = array<i32>} : memref<1x8x8xf32, #tpu.memory_space<vmem>>, vector<1x8x8xf32>,
    %72 = arith.truncf %65 : vector<8x8xf32> to vector<8x8xbf16>
    %cst_40 = arith.constant dense<0.000000e+00> : vector<8x128xf32>
    %73 = tpu.matmul %72, %54, %cst_40 {dimension_numbers = #tpu.dot_dimension_numbers<[1], [0], [0], [1], [0, 0, 1, 1], [], []>} : vector<8x8xbf16>, vector<8x128xbf16>, vector<8x128xf32> -> vector<8x128xf32>
    %74 = arith.truncf %73 : vector<8x128xf32> to vector<8x128xbf16>
    %c0_41 = arith.constant 0 : index
    %c128_42 = arith.constant 128 : index
    %75 = vector.load %arg15[%c0_41, %c128_42] : memref<8x512xbf16, #tpu.memory_space<vmem>>, vector<8x128xbf16>
    tpu.vector_store %arg15[%c0_41, %c128_42], %74 {strides = array<i32>} : memref<8x512xbf16, #tpu.memory_space<vmem>>, vector<8x128xbf16>,
    %c0_43 = arith.constant 0 : index
    %c256 = arith.constant 256 : index
    %76 = vector.load %arg14[%c0_43, %c256] : memref<8x1536xbf16, #tpu.memory_space<vmem>>, vector<8x128xbf16>
    %c0_44 = arith.constant 0 : index
    %c768 = arith.constant 768 : index
    %77 = vector.load %arg14[%c0_44, %c768] : memref<8x1536xbf16, #tpu.memory_space<vmem>>, vector<8x128xbf16>
    %c0_45 = arith.constant 0 : index
    %c1280 = arith.constant 1280 : index
    %78 = vector.load %arg14[%c0_45, %c1280] : memref<8x1536xbf16, #tpu.memory_space<vmem>>, vector<8x128xbf16>
    %cst_46 = arith.constant dense<0.000000e+00> : vector<8x8xf32>
    %79 = tpu.matmul %76, %77, %cst_46 {dimension_numbers = #tpu.dot_dimension_numbers<[1], [1], [0], [0], [0, 0, 1, 0], [], []>} : vector<8x128xbf16>, vector<8x128xbf16>, vector<8x8xf32> -> vector<8x8xf32>
    %cst_47 = arith.constant dense<0xFF800000> : vector<8xf32>
    %80 = vector.multi_reduction <maximumf>, %79, %cst_47 [1] : vector<8x8xf32> to vector<8xf32>
    %81 = vector.shape_cast %80 : vector<8xf32> to vector<8x1xf32>
    %82 = vector.broadcast %81 : vector<8x1xf32> to vector<8x8xf32>
    %83 = arith.subf %79, %82 : vector<8x8xf32>
    %84 = math.exp %83 : vector<8x8xf32>
    %cst_48 = arith.constant dense<0.000000e+00> : vector<8xf32>
    %85 = vector.multi_reduction <add>, %84, %cst_48 [1] : vector<8x8xf32> to vector<8xf32>
    %86 = vector.shape_cast %85 : vector<8xf32> to vector<8x1xf32>
    %87 = tpu.reciprocal %86 {approx = true} : vector<8x1xf32> -> vector<8x1xf32>
    %88 = vector.broadcast %87 : vector<8x1xf32> to vector<8x8xf32>
    %89 = arith.mulf %84, %88 : vector<8x8xf32>
    %c0_49 = arith.constant 0 : index
    %c0_50 = arith.constant 0 : index
    %c0_51 = arith.constant 0 : index
    %90 = vector.load %arg13[%c0_49, %c0_50, %c0_51] : memref<1x8x8xf32, #tpu.memory_space<vmem>>, vector<1x8x8xf32>
    %91 = vector.shape_cast %90 : vector<1x8x8xf32> to vector<8x8xf32>
    %92 = arith.addf %91, %89 : vector<8x8xf32>
    %c0_52 = arith.constant 0 : index
    %c0_53 = arith.constant 0 : index
    %c0_54 = arith.constant 0 : index
    %93 = vector.load %arg13[%c0_52, %c0_53, %c0_54] : memref<1x8x8xf32, #tpu.memory_space<vmem>>, vector<1x8x8xf32>
    %94 = vector.shape_cast %93 : vector<1x8x8xf32> to vector<8x8xf32>
    %95 = vector.shape_cast %92 : vector<8x8xf32> to vector<1x8x8xf32>
    tpu.vector_store %arg13[%c0_52, %c0_53, %c0_54], %95 {strides = array<i32>} : memref<1x8x8xf32, #tpu.memory_space<vmem>>, vector<1x8x8xf32>,
    %96 = arith.truncf %89 : vector<8x8xf32> to vector<8x8xbf16>
    %cst_55 = arith.constant dense<0.000000e+00> : vector<8x128xf32>
    %97 = tpu.matmul %96, %78, %cst_55 {dimension_numbers = #tpu.dot_dimension_numbers<[1], [0], [0], [1], [0, 0, 1, 1], [], []>} : vector<8x8xbf16>, vector<8x128xbf16>, vector<8x128xf32> -> vector<8x128xf32>
    %98 = arith.truncf %97 : vector<8x128xf32> to vector<8x128xbf16>
    %c0_56 = arith.constant 0 : index
    %c256_57 = arith.constant 256 : index
    %99 = vector.load %arg15[%c0_56, %c256_57] : memref<8x512xbf16, #tpu.memory_space<vmem>>, vector<8x128xbf16>
    tpu.vector_store %arg15[%c0_56, %c256_57], %98 {strides = array<i32>} : memref<8x512xbf16, #tpu.memory_space<vmem>>, vector<8x128xbf16>,
    %c0_58 = arith.constant 0 : index
    %c384 = arith.constant 384 : index
    %100 = vector.load %arg14[%c0_58, %c384] : memref<8x1536xbf16, #tpu.memory_space<vmem>>, vector<8x128xbf16>
    %c0_59 = arith.constant 0 : index
    %c896 = arith.constant 896 : index
    %101 = vector.load %arg14[%c0_59, %c896] : memref<8x1536xbf16, #tpu.memory_space<vmem>>, vector<8x128xbf16>
    %c0_60 = arith.constant 0 : index
    %c1408 = arith.constant 1408 : index
    %102 = vector.load %arg14[%c0_60, %c1408] : memref<8x1536xbf16, #tpu.memory_space<vmem>>, vector<8x128xbf16>
    %cst_61 = arith.constant dense<0.000000e+00> : vector<8x8xf32>
    %103 = tpu.matmul %100, %101, %cst_61 {dimension_numbers = #tpu.dot_dimension_numbers<[1], [1], [0], [0], [0, 0, 1, 0], [], []>} : vector<8x128xbf16>, vector<8x128xbf16>, vector<8x8xf32> -> vector<8x8xf32>
    %cst_62 = arith.constant dense<0xFF800000> : vector<8xf32>
    %104 = vector.multi_reduction <maximumf>, %103, %cst_62 [1] : vector<8x8xf32> to vector<8xf32>
    %105 = vector.shape_cast %104 : vector<8xf32> to vector<8x1xf32>
    %106 = vector.broadcast %105 : vector<8x1xf32> to vector<8x8xf32>
    %107 = arith.subf %103, %106 : vector<8x8xf32>
    %108 = math.exp %107 : vector<8x8xf32>
    %cst_63 = arith.constant dense<0.000000e+00> : vector<8xf32>
    %109 = vector.multi_reduction <add>, %108, %cst_63 [1] : vector<8x8xf32> to vector<8xf32>
    %110 = vector.shape_cast %109 : vector<8xf32> to vector<8x1xf32>
    %111 = tpu.reciprocal %110 {approx = true} : vector<8x1xf32> -> vector<8x1xf32>
    %112 = vector.broadcast %111 : vector<8x1xf32> to vector<8x8xf32>
    %113 = arith.mulf %108, %112 : vector<8x8xf32>
    %c0_64 = arith.constant 0 : index
    %c0_65 = arith.constant 0 : index
    %c0_66 = arith.constant 0 : index
    %114 = vector.load %arg13[%c0_64, %c0_65, %c0_66] : memref<1x8x8xf32, #tpu.memory_space<vmem>>, vector<1x8x8xf32>
    %115 = vector.shape_cast %114 : vector<1x8x8xf32> to vector<8x8xf32>
    %116 = arith.addf %115, %113 : vector<8x8xf32>
    %c0_67 = arith.constant 0 : index
    %c0_68 = arith.constant 0 : index
    %c0_69 = arith.constant 0 : index
    %117 = vector.load %arg13[%c0_67, %c0_68, %c0_69] : memref<1x8x8xf32, #tpu.memory_space<vmem>>, vector<1x8x8xf32>
    %118 = vector.shape_cast %117 : vector<1x8x8xf32> to vector<8x8xf32>
    %119 = vector.shape_cast %116 : vector<8x8xf32> to vector<1x8x8xf32>
    tpu.vector_store %arg13[%c0_67, %c0_68, %c0_69], %119 {strides = array<i32>} : memref<1x8x8xf32, #tpu.memory_space<vmem>>, vector<1x8x8xf32>,
    %120 = arith.truncf %113 : vector<8x8xf32> to vector<8x8xbf16>
    %cst_70 = arith.constant dense<0.000000e+00> : vector<8x128xf32>
    %121 = tpu.matmul %120, %102, %cst_70 {dimension_numbers = #tpu.dot_dimension_numbers<[1], [0], [0], [1], [0, 0, 1, 1], [], []>} : vector<8x8xbf16>, vector<8x128xbf16>, vector<8x128xf32> -> vector<8x128xf32>
    %122 = arith.truncf %121 : vector<8x128xf32> to vector<8x128xbf16>
    %c0_71 = arith.constant 0 : index
    %c384_72 = arith.constant 384 : index
    %123 = vector.load %arg15[%c0_71, %c384_72] : memref<8x512xbf16, #tpu.memory_space<vmem>>, vector<8x128xbf16>
    tpu.vector_store %arg15[%c0_71, %c384_72], %122 {strides = array<i32>} : memref<8x512xbf16, #tpu.memory_space<vmem>>, vector<8x128xbf16>,
    %c0_73 = arith.constant 0 : index
    %c0_74 = arith.constant 0 : index
    %c0_75 = arith.constant 0 : index
    %124 = vector.load %arg13[%c0_73, %c0_74, %c0_75] : memref<1x8x8xf32, #tpu.memory_space<vmem>>, vector<1x8x8xf32>
    %125 = vector.shape_cast %124 : vector<1x8x8xf32> to vector<8x8xf32>
    %cst_76 = arith.constant 2.500000e-01 : f32
    %126 = vector.broadcast %cst_76 : f32 to vector<8x8xf32>
    %127 = arith.mulf %125, %126 : vector<8x8xf32>
    %c0_77 = arith.constant 0 : index
    %c0_78 = arith.constant 0 : index
    %c0_79 = arith.constant 0 : index
    %128 = vector.load %arg13[%c0_77, %c0_78, %c0_79] : memref<1x8x8xf32, #tpu.memory_space<vmem>>, vector<1x8x8xf32>
    %129 = vector.shape_cast %128 : vector<1x8x8xf32> to vector<8x8xf32>
    %130 = vector.shape_cast %127 : vector<8x8xf32> to vector<1x8x8xf32>
    tpu.vector_store %arg13[%c0_77, %c0_78, %c0_79], %130 {strides = array<i32>} : memref<1x8x8xf32, #tpu.memory_space<vmem>>, vector<1x8x8xf32>,
    %c0_80 = arith.constant 0 : index
    %c0_81 = arith.constant 0 : index
    %131 = vector.load %arg15[%c0_80, %c0_81] : memref<8x512xbf16, #tpu.memory_space<vmem>>, vector<8x512xbf16>
    %c0_82 = arith.constant 0 : index
    %c0_83 = arith.constant 0 : index
    %132 = vector.load %arg3[%c0_82, %c0_83] : memref<512x32xbf16, #tpu.memory_space<vmem>>, vector<512x32xbf16>
    %cst_84 = arith.constant dense<0.000000e+00> : vector<8x32xf32>
    %133 = tpu.matmul %131, %132, %cst_84 {dimension_numbers = #tpu.dot_dimension_numbers<[1], [0], [0], [1], [0, 0, 1, 1], [], []>} : vector<8x512xbf16>, vector<512x32xbf16>, vector<8x32xf32> -> vector<8x32xf32>
    %134 = arith.addf %1, %133 : vector<8x32xf32>
    %c0_85 = arith.constant 0 : index
    %c0_86 = arith.constant 0 : index
    %135 = vector.load %arg6[%c0_85, %c0_86] : memref<1x32xf32, #tpu.memory_space<vmem>>, vector<1x32xf32>
    %c0_87 = arith.constant 0 : index
    %c0_88 = arith.constant 0 : index
    %136 = vector.load %arg7[%c0_87, %c0_88] : memref<1x32xf32, #tpu.memory_space<vmem>>, vector<1x32xf32>
    %cst_89 = arith.constant dense<0.000000e+00> : vector<8xf32>
    %137 = vector.multi_reduction <add>, %134, %cst_89 [1] : vector<8x32xf32> to vector<8xf32>
    %138 = vector.shape_cast %137 : vector<8xf32> to vector<8x1xf32>
    %cst_90 = arith.constant 3.200000e+01 : f32
    %139 = vector.broadcast %cst_90 : f32 to vector<8x1xf32>
    %140 = arith.divf %138, %139 : vector<8x1xf32>
    %141 = vector.broadcast %140 : vector<8x1xf32> to vector<8x32xf32>
    %142 = arith.subf %134, %141 : vector<8x32xf32>
    %143 = arith.mulf %142, %142 : vector<8x32xf32>
    %cst_91 = arith.constant dense<0.000000e+00> : vector<8xf32>
    %144 = vector.multi_reduction <add>, %143, %cst_91 [1] : vector<8x32xf32> to vector<8xf32>
    %145 = vector.shape_cast %144 : vector<8xf32> to vector<8x1xf32>
    %cst_92 = arith.constant 3.200000e+01 : f32
    %146 = vector.broadcast %cst_92 : f32 to vector<8x1xf32>
    %147 = arith.divf %145, %146 : vector<8x1xf32>
    %148 = vector.broadcast %140 : vector<8x1xf32> to vector<8x32xf32>
    %149 = arith.subf %134, %148 : vector<8x32xf32>
    %cst_93 = arith.constant 9.99999974E-6 : f32
    %150 = vector.broadcast %cst_93 : f32 to vector<8x1xf32>
    %151 = arith.addf %147, %150 : vector<8x1xf32>
    %152 = math.rsqrt %151 : vector<8x1xf32>
    %153 = vector.broadcast %152 : vector<8x1xf32> to vector<8x32xf32>
    %154 = arith.mulf %149, %153 : vector<8x32xf32>
    %155 = vector.broadcast %135 : vector<1x32xf32> to vector<8x32xf32>
    %156 = arith.mulf %154, %155 : vector<8x32xf32>
    %157 = vector.broadcast %136 : vector<1x32xf32> to vector<8x32xf32>
    %158 = arith.addf %156, %157 : vector<8x32xf32>
    %159 = arith.truncf %158 : vector<8x32xf32> to vector<8x32xbf16>
    %c0_94 = arith.constant 0 : index
    %c0_95 = arith.constant 0 : index
    %160 = vector.load %arg8[%c0_94, %c0_95] : memref<32x64xbf16, #tpu.memory_space<vmem>>, vector<32x64xbf16>
    %cst_96 = arith.constant dense<0.000000e+00> : vector<8x64xf32>
    %161 = tpu.matmul %159, %160, %cst_96 {dimension_numbers = #tpu.dot_dimension_numbers<[1], [0], [0], [1], [0, 0, 1, 1], [], []>} : vector<8x32xbf16>, vector<32x64xbf16>, vector<8x64xf32> -> vector<8x64xf32>
    %c0_97 = arith.constant 0 : index
    %c0_98 = arith.constant 0 : index
    %162 = vector.load %arg9[%c0_97, %c0_98] : memref<1x64xf32, #tpu.memory_space<vmem>>, vector<1x64xf32>
    %163 = vector.broadcast %162 : vector<1x64xf32> to vector<8x64xf32>
    %164 = arith.addf %161, %163 : vector<8x64xf32>
    %cst_99 = arith.constant 0.000000e+00 : f32
    %165 = vector.broadcast %cst_99 : f32 to vector<8x64xf32>
    %166 = arith.maximumf %164, %165 : vector<8x64xf32>
    %167 = arith.truncf %166 : vector<8x64xf32> to vector<8x64xbf16>
    %c0_100 = arith.constant 0 : index
    %c0_101 = arith.constant 0 : index
    %168 = vector.load %arg10[%c0_100, %c0_101] : memref<64x32xbf16, #tpu.memory_space<vmem>>, vector<64x32xbf16>
    %cst_102 = arith.constant dense<0.000000e+00> : vector<8x32xf32>
    %169 = tpu.matmul %167, %168, %cst_102 {dimension_numbers = #tpu.dot_dimension_numbers<[1], [0], [0], [1], [0, 0, 1, 1], [], []>} : vector<8x64xbf16>, vector<64x32xbf16>, vector<8x32xf32> -> vector<8x32xf32>
    %c0_103 = arith.constant 0 : index
    %c0_104 = arith.constant 0 : index
    %170 = vector.load %arg11[%c0_103, %c0_104] : memref<1x32xf32, #tpu.memory_space<vmem>>, vector<1x32xf32>
    %171 = vector.broadcast %170 : vector<1x32xf32> to vector<8x32xf32>
    %172 = arith.addf %169, %171 : vector<8x32xf32>
    %173 = arith.addf %134, %172 : vector<8x32xf32>
    %c0_105 = arith.constant 0 : index
    %c0_106 = arith.constant 0 : index
    %c0_107 = arith.constant 0 : index
    %174 = vector.load %arg12[%c0_105, %c0_106, %c0_107] : memref<1x8x32xf32, #tpu.memory_space<vmem>>, vector<1x8x32xf32>
    %175 = vector.shape_cast %174 : vector<1x8x32xf32> to vector<8x32xf32>
    %176 = vector.shape_cast %173 : vector<8x32xf32> to vector<1x8x32xf32>
    tpu.vector_store %arg12[%c0_105, %c0_106, %c0_107], %176 {strides = array<i32>} : memref<1x8x32xf32, #tpu.memory_space<vmem>>, vector<1x8x32xf32>,
    return
  }
  func.func @transform_0(%arg0: i32) -> (i32, i32, i32) {
    %c0_i32 = arith.constant 0 : i32
    %c0_i32_0 = arith.constant 0 : i32
    %c0_i32_1 = arith.constant 0 : i32
    return %arg0, %c0_i32, %c0_i32_0 : i32, i32, i32
  }
  func.func @transform_1(%arg0: i32) -> (i32, i32) {
    %c0_i32 = arith.constant 0 : i32
    %c0_i32_0 = arith.constant 0 : i32
    %c0_i32_1 = arith.constant 0 : i32
    return %c0_i32, %c0_i32_0 : i32, i32
  }
  func.func @transform_2(%arg0: i32) -> (i32, i32) {
    %c0_i32 = arith.constant 0 : i32
    %c0_i32_0 = arith.constant 0 : i32
    %c0_i32_1 = arith.constant 0 : i32
    return %c0_i32, %c0_i32_0 : i32, i32
  }
  func.func @transform_3(%arg0: i32) -> (i32, i32) {
    %c0_i32 = arith.constant 0 : i32
    %c0_i32_0 = arith.constant 0 : i32
    %c0_i32_1 = arith.constant 0 : i32
    return %c0_i32, %c0_i32_0 : i32, i32
  }
  func.func @transform_4(%arg0: i32) -> (i32, i32) {
    %c0_i32 = arith.constant 0 : i32
    %c0_i32_0 = arith.constant 0 : i32
    %c0_i32_1 = arith.constant 0 : i32
    return %c0_i32, %c0_i32_0 : i32, i32
  }
  func.func @transform_5(%arg0: i32) -> (i32, i32) {
    %c0_i32 = arith.constant 0 : i32
    %c0_i32_0 = arith.constant 0 : i32
    %c0_i32_1 = arith.constant 0 : i32
    return %c0_i32, %c0_i32_0 : i32, i32
  }
  func.func @transform_6(%arg0: i32) -> (i32, i32) {
    %c0_i32 = arith.constant 0 : i32
    %c0_i32_0 = arith.constant 0 : i32
    %c0_i32_1 = arith.constant 0 : i32
    return %c0_i32, %c0_i32_0 : i32, i32
  }
  func.func @transform_7(%arg0: i32) -> (i32, i32) {
    %c0_i32 = arith.constant 0 : i32
    %c0_i32_0 = arith.constant 0 : i32
    %c0_i32_1 = arith.constant 0 : i32
    return %c0_i32, %c0_i32_0 : i32, i32
  }
  func.func @transform_8(%arg0: i32) -> (i32, i32) {
    %c0_i32 = arith.constant 0 : i32
    %c0_i32_0 = arith.constant 0 : i32
    %c0_i32_1 = arith.constant 0 : i32
    return %c0_i32, %c0_i32_0 : i32, i32
  }
  func.func @transform_9(%arg0: i32) -> (i32, i32) {
    %c0_i32 = arith.constant 0 : i32
    %c0_i32_0 = arith.constant 0 : i32
    %c0_i32_1 = arith.constant 0 : i32
    return %c0_i32, %c0_i32_0 : i32, i32
  }
  func.func @transform_10(%arg0: i32) -> (i32, i32) {
    %c0_i32 = arith.constant 0 : i32
    %c0_i32_0 = arith.constant 0 : i32
    %c0_i32_1 = arith.constant 0 : i32
    return %c0_i32, %c0_i32_0 : i32, i32
  }
  func.func @transform_11(%arg0: i32) -> (i32, i32, i32) {
    %c0_i32 = arith.constant 0 : i32
    %c0_i32_0 = arith.constant 0 : i32
    %c0_i32_1 = arith.constant 0 : i32
    return %arg0, %c0_i32, %c0_i32_0 : i32, i32, i32
  }
  func.func @transform_12(%arg0: i32) -> (i32, i32, i32) {
    %c0_i32 = arith.constant 0 : i32
    %c0_i32_0 = arith.constant 0 : i32
    %c0_i32_1 = arith.constant 0 : i32
    return %arg0, %c0_i32, %c0_i32_0 : i32, i32, i32
  }
}

</mosaic_0001>

<bundles_post_ra>
// kernel: tpu_custom_call.1
= control target key start
LH: loop header
LB: loop body
LE: loop exit
PB: predicated region body
PF: predicated region fallthrough
CT: control target
= control target key end

     0   :  { %s2594_s0 = inlined_call_operand.vmem [shape: f32[2,8,32], index: 0, kind: input, shape index: {}]   ;;  %s2595_s1 = inlined_call_operand.vmem [shape: bf16[32,1536], index: 1, kind: input, shape index: {}]   ;;  %s2596_s2 = inlined_call_operand.vmem [shape: bf16[512,32], index: 2, kind: input, shape index: {}]   ;;  %s2597_s3 = inlined_call_operand.vmem [shape: f32[1,32], index: 3, kind: input, shape index: {}]   ;;  %s2598_s4 = inlined_call_operand.vmem [shape: f32[1,32], index: 4, kind: input, shape index: {}]   ;;  %s2599_s5 = inlined_call_operand.vmem [shape: f32[1,32], index: 5, kind: input, shape index: {}]   ;;  %s2600_s6 = inlined_call_operand.vmem [shape: f32[1,32], index: 6, kind: input, shape index: {}]   ;;  %s2601_s7 = inlined_call_operand.vmem [shape: bf16[32,64], index: 7, kind: input, shape index: {}]   ;;  %s2602_s8 = inlined_call_operand.vmem [shape: f32[1,64], index: 8, kind: input, shape index: {}]   ;;  %s2603_s9 = inlined_call_operand.vmem [shape: bf16[64,32], index: 9, kind: input, shape index: {}]   ;;  %s2604_s10 = inlined_call_operand.vmem [shape: f32[1,32], index: 10, kind: input, shape index: {}]   ;;  %s2605_s11 = inlined_call_operand.hbm [shape: f32[2,8,32], index: 11, kind: output, shape index: {0}]   ;;  %s2606_s12 = inlined_call_operand.hbm [shape: f32[2,8,8], index: 12, kind: output, shape index: {1}]  }
   0x1   :  { %2608 = sst [smem:[#allocation11_spill]] %s2594_s0 }
   0x2   :  { %2609 = sst [smem:[#allocation12_spill]] %s2595_s1 }
   0x3   :  { %2610 = sst [smem:[#allocation13_spill]] %s2596_s2 }
   0x4   :  { %2611 = sst [smem:[#allocation14_spill]] %s2597_s3 }
   0x5   :  { %2612 = sst [smem:[#allocation15_spill]] %s2598_s4 }
   0x6   :  { %18 = vsyncpa [#allocation5], 0 }
   0x7   :  { %20 = vsyncpa [#allocation5 + $0x1], 0 }
   0x8   :  { %21 = vsyncpa [#allocation7], 0 }
   0x9   :  { %23 = vsyncpa [#allocation7 + $0x1], 0  ;;  %s2143_s21 = smov 0   ;;  %s2145_s22 = smov 0  }
   0xa   :  { %s2147_s23 = smov 0   ;;  %s2149_s24 = smov 0  }
   0xb LB: > { %s2164_s25 = sadd.s32 4294967295, %s2075_s24   ;;  %s1567_s26 = sadd.s32 4294967294, %s2075_s24   ;;  %s2075_s24 = sphi %s2149_s24, %s2626_s24   ;;  %s2071_s23 = sphi %s2147_s23, %s2625_s23   ;;  %s2067_s22 = sphi %s2145_s22, %s2624_s22   ;;  %s2063_s21 = sphi %s2143_s21, %s2623_s21  }
   0xc   : > { %s2168_s27 = sadd.s32 1, %s2075_s24   ;;  %s272_s28 = sadd.s32 1, %s2071_s23 }
   0xd   : > { %s269_s29 = ssub.s32 %s2075_s24, %s2168_s27  ;;  %p282_p0 = scmp.ne.s32.totalorder %s2071_s23, %s2067_s22 }
   0xe   : > { %p270_p1 = scmp.eq.s32.totalorder %s269_s29, 0  ;;  %p283_p2 = scmp.eq.s32.totalorder %s2164_s25, 1 }
   0xf   : > { %p288_p3 = scmp.ne.s32.totalorder %s2067_s22, %s2063_s21  ;;  %p289_p4 = scmp.eq.s32.totalorder %s1567_s26, 1 }
  0x10   : > { %s2179_s30 = scalar_select %p270_p1, %s2071_s23, %s272_s28  }
  0x11   : > { %p2181_p5 = por %p283_p2, %p282_p0  ;;  %p2185_p6 = por %p289_p4, %p288_p3 }
  0x12   : > { %2613 = sst [smem:[#allocation10_spill]] %s2179_s30  ;;  %p1570_p7 = scmp.ge.s32.totalorder %s2075_s24, 1 }
  0x13   : > { %p370_p8 = scmp.lt.s32.totalorder %s2075_s24, 3 }
  0x15   : > { %p371_p9 = pnand %p1570_p7, %p370_p8 }
  0x16   : > { %p416_p10 = scmp.lt.s32.totalorder (!%p371_p9), %s2164_s25, 1  ;;  %s2616_s0 = sld [smem:[#allocation11_spill]] (!%p371_p9) }
  0x17   : > { %374 = sbr.rel (%p371_p9) target bundleno = 1688 (0x698), region = 64  ;;  %s2617_s1 = sld [smem:[#allocation12_spill]] (!%p371_p9) }
  0x18   : > { %s2618_s3 = sld [smem:[#allocation14_spill]] (!%p371_p9)  ;;  %s1842_s18 = sshll.u32 (!%p371_p9), %s2164_s25, 3 }
  0x19   : > { %s2619_s4 = sld [smem:[#allocation15_spill]] (!%p371_p9) }
  0x1a   : > { %s2620_s2 = sld [smem:[#allocation13_spill]] (!%p371_p9) }
  0x1c   : > { %s417_s15 = scalar_select %p416_p10, %s2164_s25, 1  ;;  %vm424_vm0 = vcmask 261120   ;;  %v2077_v2 = vmov 32.0   ;;  %vm811_vm5 = vcmask 1043456   ;;  %vm794_vm6 = vcmask 64512  }
  0x1d   : > { %1959 = vrcp.f32 %v2077_v2  ;;  %v1624_v14 = vld [vmem:[%s2617_s1 + $0x60] sm:$0xf]  ;;  %v1864_v15 = vld [vmem:[%s2617_s1 + $0x8c] sm:$0xf0]  ;;  %v1858_v16 = vld [vmem:[%s2617_s1 + $0x64] sm:$0xf] }
  0x1e   : > { %s1573_s16 = sshll.u32 %s417_s15, 3  ;;  %v1625_v17 = vor.u32 %v1864_v15, %v1624_v14  ;;  %v1626_v18 = vld [vmem:[%s2617_s1 + $0x90] sm:$0xf0]  ;;  %v1632_v19 = vld [vmem:[%s2617_s1 + $0x68] sm:$0xf]  ;;  %vm1421_vm10 = vcmask 523264  }
  0x1f   : > { %s419_s19 = scalar_lea.vmem %s2616_s0, %s1573_s16  ;;  %v1865_v20 = vld [vmem:[%s2617_s1 + $0x94] sm:$0xf0]  ;;  %v1629_v21 = vor.u32 %v1858_v16, %v1626_v18  ;;  %v1859_v23 = vld [vmem:[%s2617_s1 + $0x6c] sm:$0xf]  ;;  %v1634_v24 = vld [vmem:[%s2617_s1 + $0x98] sm:$0xf0] }
  0x20   : > { %v2196_v0 = vld [vmem:[%s419_s19] sm:$0xff]  ;;  %v1633_v22 = vor.u32 %v1865_v20, %v1632_v19  ;;  %616 = vmatpush.bf16.msra.mxu0 %v1625_v17  ;;  %v1637_v25 = vor.u32 %v1859_v23, %v1634_v24  ;;  %v1852_v27 = vld [vmem:[%s2617_s1 + $0x2c] sm:$0xf0]  ;;  %v1578_v30 = vld [vmem:[%s2617_s1 + $0x30] sm:$0xf0]  ;;  %s2388_s0 = sand.u32 1, %s2067_s22  }
  0x21   : > { %v425_v1 = vsel %vm424_vm0, %v2196_v0, 0.0  ;;  %629 = vmatpush.bf16.msra.mxu1 %v1629_v21  ;;  %v1576_v26 = vld [vmem:[%s2617_s1] sm:$0xf]  ;;  %v1846_v28 = vld [vmem:[%s2617_s1 + $0x4] sm:$0xf]  ;;  %s2607_s17 = sshll.u32 %s2388_s0, 3 }
  0x22   : > { %426 = vadd.xlane.f32.xlu0 %v425_v1  ;;  %642 = vmatpush.bf16.msra.mxu2 %v1633_v22  ;;  %v1577_v29 = vor.u32 %v1852_v27, %v1576_v26  ;;  %v1584_v31 = vld [vmem:[%s2617_s1 + $0x8] sm:$0xf]  ;;  %v1853_v32 = vld [vmem:[%s2617_s1 + $0x34] sm:$0xf0]  ;;  %v1581_v33 = vor.u32 %v1846_v28, %v1578_v30  ;;  %v1847_v35 = vld [vmem:[%s2617_s1 + $0xc] sm:$0xf] }
  0x23   : > { %v1960_v3 = vpop.eup %1959  ;;  %655 = vmatpush.bf16.msra.mxu3 %v1637_v25  ;;  %v1585_v34 = vor.u32 %v1853_v32, %v1584_v31  ;;  %v1586_v36 = vld [vmem:[%s2617_s1 + $0x38] sm:$0xf0]  ;;  %v1640_v39 = vld [vmem:[%s2617_s1 + $0x70] sm:$0xf]  ;;  %v1866_v40 = vld [vmem:[%s2617_s1 + $0x9c] sm:$0xf0] }
  0x24   : > { %v429_v4 = vmul.f32 32.0, %v1960_v3  ;;  %vm433_vm1 = vweird.f32 %v1960_v3  ;;  %617 = vmatpush.bf16.msra.mxu0 %v1577_v29  ;;  %v1589_v37 = vor.u32 %v1847_v35, %v1586_v36  ;;  %v1860_v41 = vld [vmem:[%s2617_s1 + $0x74] sm:$0xf]  ;;  %v1641_v43 = vor.u32 %v1866_v40, %v1640_v39  ;;  %v1642_v44 = vld [vmem:[%s2617_s1 + $0xa0] sm:$0xf0]  ;;  %s2403_s28 = scalar_lea.vmem [#allocation6], %s2607_s17  ;;  %s1470_s17 = scalar_lea.hbm %s2606_s12, %s1842_s18 }
  0x25   : > { %630 = vmatpush.bf16.msra.mxu1 %v1581_v33  ;;  %v1648_v45 = vld [vmem:[%s2617_s1 + $0x78] sm:$0xf]  ;;  %v1867_v46 = vld [vmem:[%s2617_s1 + $0xa4] sm:$0xf0]  ;;  %v1645_v47 = vor.u32 %v1860_v41, %v1642_v44  ;;  %v1861_v49 = vld [vmem:[%s2617_s1 + $0x7c] sm:$0xf] }
  0x26   : > { %v430_v5 = vsub.f32 1.0, %v429_v4  ;;  %643 = vmatpush.bf16.msra.mxu2 %v1585_v34  ;;  %v1649_v48 = vor.u32 %v1867_v46, %v1648_v45  ;;  %v1650_v50 = vld [vmem:[%s2617_s1 + $0xa8] sm:$0xf0]  ;;  %v1592_v51 = vld [vmem:[%s2617_s1 + $0x10] sm:$0xf]  ;;  %s1472_s20 = sshll.u32 %s2403_s28, 4  ;;  %s1473_s20 = int_to_ptr.vmem [resolvable:$true] %s1472_s20 }
  0x27   : > { %656 = vmatpush.bf16.msra.mxu3 %v1589_v37  ;;  %v1653_v53 = vor.u32 %v1861_v49, %v1650_v50  ;;  %v1854_v54 = vld [vmem:[%s2617_s1 + $0x3c] sm:$0xf0]  ;;  %v1848_v55 = vld [vmem:[%s2617_s1 + $0x14] sm:$0xf]  ;;  %v1594_v57 = vld [vmem:[%s2617_s1 + $0x40] sm:$0xf0] }
  0x28   : > { %v431_v6 = vmul.f32 %v1960_v3, %v430_v5  ;;  %668 = vmatpush.bf16.msrb.mxu0 %v1641_v43  ;;  %v1593_v56 = vor.u32 %v1854_v54, %v1592_v51  ;;  %v1600_v58 = vld [vmem:[%s2617_s1 + $0x18] sm:$0xf]  ;;  %v1855_v59 = vld [vmem:[%s2617_s1 + $0x44] sm:$0xf0]  ;;  %v1597_v60 = vor.u32 %v1848_v55, %v1594_v57  ;;  %v1849_v62 = vld [vmem:[%s2617_s1 + $0x1c] sm:$0xf] }
  0x29   : > { %681 = vmatpush.bf16.msrb.mxu1 %v1645_v47  ;;  %v1601_v61 = vor.u32 %v1855_v59, %v1600_v58  ;;  %v1602_v63 = vld [vmem:[%s2617_s1 + $0x48] sm:$0xf0]  ;;  %v1656_v15 = vld [vmem:[%s2617_s1 + $0x80] sm:$0xf]  ;;  %v1868_v16 = vld [vmem:[%s2617_s1 + $0xac] sm:$0xf0] }
  0x2a   : > { %v432_v7 = vadd.f32 %v1960_v3, %v431_v6  ;;  %694 = vmatpush.bf16.msrb.mxu2 %v1649_v48  ;;  %v1605_v1 = vor.u32 %v1849_v62, %v1602_v63  ;;  %v1862_v17 = vld [vmem:[%s2617_s1 + $0x84] sm:$0xf]  ;;  %v1658_v18 = vld [vmem:[%s2617_s1 + $0xb0] sm:$0xf0]  ;;  %v1869_v20 = vld [vmem:[%s2617_s1 + $0xb4] sm:$0xf0]  ;;  %v1657_v24 = vor.u32 %v1868_v16, %v1656_v15 }
  0x2b   : > { %707 = vmatpush.bf16.msrb.mxu3 %v1653_v53  ;;  %v1863_v21 = vld [vmem:[%s2617_s1 + $0x8c] sm:$0xf]  ;;  %v1666_v22 = vld [vmem:[%s2617_s1 + $0xb8] sm:$0xf0]  ;;  %v1661_v25 = vor.u32 %v1862_v17, %v1658_v18  ;;  %v1608_v26 = vld [vmem:[%s2617_s1 + $0x20] sm:$0xf] }
  0x2c   : > { %v2200_v8 = vsel %vm433_vm1, %v1960_v3, %v432_v7  ;;  %669 = vmatpush.bf16.msrb.mxu0 %v1593_v56  ;;  %v1856_v27 = vld [vmem:[%s2617_s1 + $0x4c] sm:$0xf0]  ;;  %v1669_v29 = vor.u32 %v1863_v21, %v1666_v22  ;;  %v1850_v30 = vld [vmem:[%s2617_s1 + $0x24] sm:$0xf]  ;;  %v1610_v31 = vld [vmem:[%s2617_s1 + $0x50] sm:$0xf0] }
  0x2d   : > { %682 = vmatpush.bf16.msrb.mxu1 %v1597_v60  ;;  %v1616_v32 = vld [vmem:[%s2617_s1 + $0x28] sm:$0xf]  ;;  %v1857_v33 = vld [vmem:[%s2617_s1 + $0x54] sm:$0xf0]  ;;  %v1851_v34 = vld [vmem:[%s2617_s1 + $0x2c] sm:$0xf]  ;;  %v1609_v36 = vor.u32 %v1856_v27, %v1608_v26  ;;  %v1613_v37 = vor.u32 %v1850_v30, %v1610_v31 }
  0x2e   : > { %695 = vmatpush.bf16.msrb.mxu2 %v1601_v61  ;;  %v1618_v35 = vld [vmem:[%s2617_s1 + $0x58] sm:$0xf0]  ;;  %s1474_s26 = sshll.u32 %s1470_s17, 4  ;;  %s1446_s29 = scalar_lea.sflag [#allocation7], %s2388_s0  ;;  %s1475_s26 = int_to_ptr.hbm [resolvable:$true] %s1474_s26 }
  0x2f   : > { %708 = vmatpush.bf16.msrb.mxu3 %v1605_v1  ;;  %v1621_v39 = vor.u32 %v1851_v34, %v1618_v35  ;;  %s1995_s15 = sshra.s32 %s1475_s26, 4  ;;  %s2001_s25 = scalar_lea.hbm %s2606_s12, 16  ;;  %s1996_s15 = int_to_ptr.hbm [resolvable:$true] %s1995_s15 }
  0x30   : > { %s1997_s16 = scalar_lea.hbm %s1996_s15, 8  ;;  %p2002_p0 = scmp.lt.s32.totalorder %s1996_s15, %s2606_s12 }
  0x31   : > { %p1998_p11 = scmp.ne.s32.totalorder %s1996_s15, %s1997_s16  ;;  %p2003_p1 = scmp.lt.s32.totalorder %s2001_s25, %s1997_s16 }
  0x33   : > { %p1999_p12 = pnand %p1998_p11, %p2181_p5  ;;  %p2004_p2 = por %p2003_p1, %p2002_p0 }
  0x35   : > { %p2000_p13 = pneg %p1999_p12 }
  0x37   : > { %p2005_p3 = pnand %p2004_p2, %p2000_p13 }
  0x95   : > { %v427_v9 = vpop.xlane.xlu0 %426 }
  0x96   : > { %v435_v10 = vmul.f32 %v2200_v8, %v427_v9  ;;  %v1953_v9 = vld [vmem:[%s2618_s3] ss:$0 sm:$0xff] }
  0x98   : > { %v2204_v11 = vsub.f32 %v2196_v0, %v435_v10 }
  0x9a   : > { %v437_v12 = vmul.f32 %v2204_v11, %v2204_v11 }
  0x9c   : > { %v438_v13 = vsel %vm424_vm0, %v437_v12, 0.0  ;;  %v1954_v12 = vld [vmem:[%s2619_s4] ss:$0 sm:$0xff] }
  0x9d   : > { %439 = vadd.xlane.f32.xlu0 %v438_v13 }
 0x110   : > { %v440_v38 = vpop.xlane.xlu0 %439 }
 0x111   : > { %v441_v42 = vmul.f32 %v440_v38, %v2200_v8  ;;  %v1617_v38 = vor.u32 %v1857_v33, %v1616_v32 }
 0x113   : > { %v442_v52 = vadd.f32 1e-05, %v441_v42 }
 0x115   : > { %1961 = vrsqrt.f32 %v442_v52  ;;  %vm449_vm3 = vweird.f32 %v442_v52 }
 0x11b   : > { %v1962_v2 = vpop.eup %1961 }
 0x11c   : > { %v444_v3 = vmul.f32 %v1962_v2, %v442_v52  ;;  %vm450_vm2 = vweird.f32 %v1962_v2 }
 0x11d   : > { %vm451_vm4 = vmor %vm449_vm3, %vm450_vm2 }
 0x11e   : > { %v445_v4 = vmul.f32 %v1962_v2, %v444_v3 }
 0x120   : > { %v446_v5 = vmul.f32 0.5, %v445_v4 }
 0x122   : > { %v447_v6 = vsub.f32 1.5, %v446_v5 }
 0x124   : > { %v448_v7 = vmul.f32 %v1962_v2, %v447_v6 }
 0x126   : > { %v452_v10 = vsel %vm451_vm4, %v1962_v2, %v448_v7 }
 0x127   : > { %v453_v13 = vmul.f32 %v452_v10, %v2204_v11  ;;  %v1664_v11 = vld [vmem:[%s2617_s1 + $0x88] sm:$0xf] }
 0x128   : > { %v1665_v28 = vor.u32 %v1869_v20, %v1664_v11 }
 0x129   : > { %v457_v14 = vmul.f32 %v1953_v9, %v453_v13 }
 0x12b   : > { %v461_v19 = vadd.f32 %v1954_v12, %v457_v14 }
 0x12d   : > { %v462_v23 = vpack.c.bf16 %v461_v19, %v461_v19 }
 0x12f   : > { %1670 = vmatmul.msk.bf16.vlgmr.msra.gmra.mxu0 %vm424_vm0, %v462_v23  ;;  %1671 = vmatmul.msk.bf16.vlgmr.msra.gmra.mxu1 %vm424_vm0, %v462_v23 }
 0x130   : > { %1672 = vmatmul.msk.bf16.vlgmr.msra.gmra.mxu2 %vm424_vm0, %v462_v23  ;;  %1673 = vmatmul.msk.bf16.vlgmr.msra.gmra.mxu3 %vm424_vm0, %v462_v23 }
 0x131   : > { %720 = vmatpush.bf16.msra.mxu0 %v1657_v24  ;;  %733 = vmatpush.bf16.msra.mxu1 %v1661_v25 }
 0x132   : > { %746 = vmatpush.bf16.msra.mxu2 %v1665_v28  ;;  %759 = vmatpush.bf16.msra.mxu3 %v1669_v29 }
 0x135   : > { %721 = vmatpush.bf16.msra.mxu0 %v1609_v36  ;;  %734 = vmatpush.bf16.msra.mxu1 %v1613_v37 }
 0x136   : > { %747 = vmatpush.bf16.msra.mxu2 %v1617_v38  ;;  %760 = vmatpush.bf16.msra.mxu3 %v1621_v39 }
 0x13f   : > { %1674 = vmatmul.msk.bf16.vlgmr.msrb.gmra.mxu0 %vm424_vm0, %v462_v23  ;;  %1675 = vmatmul.msk.bf16.vlgmr.msrb.gmra.mxu1 %vm424_vm0, %v462_v23 }
 0x140   : > { %1676 = vmatmul.msk.bf16.vlgmr.msrb.gmra.mxu2 %vm424_vm0, %v462_v23  ;;  %1677 = vmatmul.msk.bf16.vlgmr.msrb.gmra.mxu3 %vm424_vm0, %v462_v23 }
 0x14f   : > { %1678 = vmatmul.msk.bf16.vlgmr.msra.gmra.mxu0 %vm424_vm0, %v462_v23  ;;  %1679 = vmatmul.msk.bf16.vlgmr.msra.gmra.mxu1 %vm424_vm0, %v462_v23 }
 0x150   : > { %1680 = vmatmul.msk.bf16.vlgmr.msra.gmra.mxu2 %vm424_vm0, %v462_v23  ;;  %1681 = vmatmul.msk.bf16.vlgmr.msra.gmra.mxu3 %vm424_vm0, %v462_v23 }
 0x1ac   : > { %v619_v40 = vpop.f32.mrf.mxu0  ;;  %v632_v41 = vpop.f32.mrf.mxu1 }
 0x1ad   : > { %v766_v42 = vpack.c.bf16 %v632_v41, %v619_v40 }
 0x1af   : > { %772 = vst [vmem:[#allocation2] sm:$0xff] %v766_v42 }
 0x1b3   : > { %v645_v43 = vpop.f32.mrf.mxu2  ;;  %v658_v44 = vpop.f32.mrf.mxu3 }
 0x1b4   : > { %v767_v45 = vpack.c.bf16 %v658_v44, %v645_v43  ;;  %v621_v46 = vpop.f32.mrf.mxu0  ;;  %v634_v47 = vpop.f32.mrf.mxu1 }
 0x1b6   : > { %773 = vst [vmem:[#allocation2 + $0x8] sm:$0xff] %v767_v45  ;;  %v778_v4 = vld [vmem:[#allocation2] sm:$0xf]  ;;  %v830_v5 = vld [vmem:[#allocation2 + $0x4] sm:$0xf] }
 0x1bb   : > { %v647_v48 = vpop.f32.mrf.mxu2  ;;  %v660_v49 = vpop.f32.mrf.mxu3 }
 0x1bc   : > { %v671_v50 = vpop.f32.mrf.mxu0  ;;  %v684_v51 = vpop.f32.mrf.mxu1 }
 0x1bd   : > { %v768_v52 = vpack.c.bf16 %v684_v51, %v671_v50  ;;  %v882_v20 = vld [vmem:[#allocation2 + $0x8] sm:$0xf]  ;;  %v934_v23 = vld [vmem:[#allocation2 + $0xc] sm:$0xf] }
 0x1bf   : > { %774 = vst [vmem:[#allocation2 + $0x10] sm:$0xff] %v768_v52 }
 0x1c3   : > { %v697_v53 = vpop.f32.mrf.mxu2  ;;  %v710_v54 = vpop.f32.mrf.mxu3 }
 0x1c4   : > { %v769_v55 = vpack.c.bf16 %v710_v54, %v697_v53  ;;  %v673_v56 = vpop.f32.mrf.mxu0  ;;  %v686_v57 = vpop.f32.mrf.mxu1 }
 0x1c5   : > { %v1877_v57 = vld [vmem:[%s2620_s2 + $0x38] sm:$0xff] }
 0x1c6   : > { %775 = vst [vmem:[#allocation2 + $0x18] sm:$0xff] %v769_v55  ;;  %v779_v58 = vld [vmem:[#allocation2 + $0x10] sm:$0xf]  ;;  %v831_v59 = vld [vmem:[#allocation2 + $0x14] sm:$0xf] }
 0x1c7   : > { %788 = vmatpush.bf16.xpose.msrb.mxu0 %v779_v58  ;;  %840 = vmatpush.bf16.xpose.msrb.mxu2 %v831_v59  ;;  %v1876_v59 = vld [vmem:[%s2620_s2 + $0x30] sm:$0xff] }
 0x1cb   : > { %v699_v60 = vpop.f32.mrf.mxu2  ;;  %v712_v61 = vpop.f32.mrf.mxu3 }
 0x1cc   : > { %v723_v62 = vpop.f32.mrf.mxu0  ;;  %v736_v63 = vpop.f32.mrf.mxu1 }
 0x1cd   : > { %v770_v1 = vpack.c.bf16 %v736_v63, %v723_v62  ;;  %v883_v2 = vld [vmem:[#allocation2 + $0x18] sm:$0xf]  ;;  %v935_v3 = vld [vmem:[#allocation2 + $0x1c] sm:$0xf]  ;;  %v1875_v63 = vld [vmem:[%s2620_s2 + $0x28] sm:$0xff] }
 0x1ce   : > { %789 = vmatmul.bf16.vlgmr.msrb.gmra.mxu0 %v778_v4  ;;  %841 = vmatmul.bf16.vlgmr.msrb.gmra.mxu2 %v830_v5  ;;  %v1885_v5 = vld [vmem:[%s2620_s2 + $0x78] sm:$0xff] }
 0x1cf   : > { %892 = vmatpush.bf16.xpose.msra.mxu0 %v883_v2  ;;  %944 = vmatpush.bf16.xpose.msra.mxu2 %v935_v3  ;;  %776 = vst [vmem:[#allocation2 + $0x20] sm:$0xff] %v770_v1  ;;  %v1874_v2 = vld [vmem:[%s2620_s2 + $0x20] sm:$0xff] }
 0x1d3   : > { %v749_v6 = vpop.f32.mrf.mxu2  ;;  %v762_v7 = vpop.f32.mrf.mxu3 }
 0x1d4   : > { %v771_v9 = vpack.c.bf16 %v762_v7, %v749_v6  ;;  %v725_v10 = vpop.f32.mrf.mxu0  ;;  %v738_v12 = vpop.f32.mrf.mxu1  ;;  %v1884_v7 = vld [vmem:[%s2620_s2 + $0x70] sm:$0xff] }
 0x1d6   : > { %777 = vst [vmem:[#allocation2 + $0x28] sm:$0xff] %v771_v9  ;;  %v780_v13 = vld [vmem:[#allocation2 + $0x20] sm:$0xf]  ;;  %v832_v14 = vld [vmem:[#allocation2 + $0x24] sm:$0xf] }
 0x1d7   : > { %v813_v15 = vsel %vm811_vm5, %v780_v13, 0  ;;  %v865_v16 = vsel %vm811_vm5, %v832_v14, 0  ;;  %1261 = vmatpush.bf16.msrb.mxu0 %v1877_v57  ;;  %v1883_v13 = vld [vmem:[%s2620_s2 + $0x68] sm:$0xff] }
 0x1d8   : > { %822 = vmatpush.bf16.msrb.mxu1 %v813_v15  ;;  %874 = vmatpush.bf16.msrb.mxu3 %v865_v16 }
 0x1db   : > { %v751_v17 = vpop.f32.mrf.mxu2  ;;  %v764_v18 = vpop.f32.mrf.mxu3  ;;  %1262 = vmatpush.bf16.msrb.mxu0 %v1876_v59 }
 0x1dc   : > { %v1882_v17 = vld [vmem:[%s2620_s2 + $0x60] sm:$0xff] }
 0x1dd   : > { %v884_v11 = vld [vmem:[#allocation2 + $0x28] sm:$0xf]  ;;  %v936_v19 = vld [vmem:[#allocation2 + $0x2c] sm:$0xf] }
 0x1de   : > { %v917_v21 = vsel %vm811_vm5, %v884_v11, 0  ;;  %v969_v22 = vsel %vm811_vm5, %v936_v19, 0  ;;  %893 = vmatmul.bf16.vlgmr.msra.gmra.mxu0 %v882_v20  ;;  %945 = vmatmul.bf16.vlgmr.msra.gmra.mxu2 %v934_v23 }
 0x1df   : > { %926 = vmatpush.bf16.msra.mxu1 %v917_v21  ;;  %978 = vmatpush.bf16.msra.mxu3 %v969_v22 }
 0x1e0   : > { %1263 = vmatpush.bf16.msrb.mxu0 %v1875_v63 }
 0x1e4   : > { %1264 = vmatpush.bf16.msrb.mxu0 %v1874_v2 }
 0x24b   : > { %v790_v24 = vpop.f32.mrf.mxu0 }
 0x24c   : > { %v795_v29 = vsel %vm794_vm6, %v790_v24, -inf }
 0x251   : > { %v842_v25 = vpop.f32.mrf.mxu2 }
 0x252   : > { %v846_v26 = vsel %vm794_vm6, %v842_v25, -inf }
 0x253   : > { %847 = vmax.xlane.f32.xlu1 %v846_v26  ;;  %v792_v27 = vpop.f32.mrf.mxu0  ;;  %v1873_v26 = vld [vmem:[%s2620_s2 + $0x18] sm:$0xff] }
 0x254   : > { %v1881_v27 = vld [vmem:[%s2620_s2 + $0x58] sm:$0xff]  ;;  %1265 = vmatpush.bf16.msrb.mxu0 %v1873_v26 }
 0x259   : > { %v844_v28 = vpop.f32.mrf.mxu2 }
 0x25a   : > { %v1893_v28 = vld [vmem:[%s2620_s2 + $0xb8] sm:$0xff] }
 0x25b   : > { %796 = vmax.xlane.f32.xlu1 %v795_v29  ;;  %v894_v30 = vpop.f32.mrf.mxu0  ;;  %v1901_v29 = vld [vmem:[%s2620_s2 + $0xf8] sm:$0xff]  ;;  %1287 = vmatpush.bf16.msrb.mxu2 %v1893_v28  ;;  %v1902_v28 = vld [vmem:[%s2601_s7] sm:$0xff] }
 0x25c   : > { %v898_v35 = vsel %vm794_vm6, %v894_v30, -inf }
 0x261   : > { %v946_v31 = vpop.f32.mrf.mxu2 }
 0x262   : > { %v950_v32 = vsel %vm794_vm6, %v946_v31, -inf }
 0x263   : > { %v896_v33 = vpop.f32.mrf.mxu0  ;;  %951 = vmax.xlane.f32.xlu2 %v950_v32  ;;  %v1892_v32 = vld [vmem:[%s2620_s2 + $0xb0] sm:$0xff] }
 0x264   : > { %v1900_v33 = vld [vmem:[%s2620_s2 + $0xf0] sm:$0xff]  ;;  %1288 = vmatpush.bf16.msrb.mxu2 %v1892_v32 }
 0x265   : > { %v1906_v32 = vld [vmem:[%s2603_s9 + $0x10] sm:$0xff] }
 0x269   : > { %v948_v34 = vpop.f32.mrf.mxu2 }
 0x26a   : > { %v1871_v34 = vld [vmem:[%s2620_s2 + $0x8] sm:$0xff] }
 0x26b   : > { %899 = vmax.xlane.f32.xlu2 %v898_v35  ;;  %v1879_v35 = vld [vmem:[%s2620_s2 + $0x48] sm:$0xff] }
 0x2c6   : > { %v848_v36 = vpop.xlane.xlu1 %847 }
 0x2c7   : > { %v849_v37 = vsub.f32 %v842_v25, %v848_v36  ;;  %v1891_v36 = vld [vmem:[%s2620_s2 + $0xa8] sm:$0xff] }
 0x2c8   : > { %1289 = vmatpush.bf16.msrb.mxu2 %v1891_v36 }
 0x2c9   : > { %v850_v38 = vmul.f32 1.442695, %v849_v37  ;;  %v1899_v37 = vld [vmem:[%s2620_s2 + $0xe8] sm:$0xff] }
 0x2cb   : > { %1963 = vpow2.f32 %v850_v38  ;;  %v1870_v38 = vld [vmem:[%s2620_s2] sm:$0xff] }
 0x2ce   : > { %v797_v39 = vpop.xlane.xlu1 %796 }
 0x2cf   : > { %v798_v40 = vsub.f32 %v790_v24, %v797_v39  ;;  %v1878_v39 = vld [vmem:[%s2620_s2 + $0x40] sm:$0xff] }
 0x2d1   : > { %v1964_v41 = vpop.eup %1963  ;;  %v799_v42 = vmul.f32 1.442695, %v798_v40  ;;  %v1890_v40 = vld [vmem:[%s2620_s2 + $0xa0] sm:$0xff] }
 0x2d2   : > { %v852_v43 = vsel %vm794_vm6, %v1964_v41, 0.0  ;;  %1290 = vmatpush.bf16.msrb.mxu2 %v1890_v40 }
 0x2d3   : > { %1965 = vpow2.f32 %v799_v42  ;;  %853 = vadd.xlane.f32.xlu0 %v852_v43  ;;  %v1889_v42 = vld [vmem:[%s2620_s2 + $0x98] sm:$0xff] }
 0x2d4   : > { %v1897_v43 = vld [vmem:[%s2620_s2 + $0xd8] sm:$0xff] }
 0x2d6   : > { %v952_v44 = vpop.xlane.xlu2 %951  ;;  %1291 = vmatpush.bf16.msrb.mxu2 %v1889_v42  ;;  %v1956_v42 = vld [vmem:[%s2600_s6] ss:$0 sm:$0xff] }
 0x2d7   : > { %v953_v45 = vsub.f32 %v946_v31, %v952_v44  ;;  %v1880_v31 = vld [vmem:[%s2620_s2 + $0x50] sm:$0xff] }
 0x2d8   : > { %v1888_v44 = vld [vmem:[%s2620_s2 + $0x90] sm:$0xff] }
 0x2d9   : > { %v1966_v46 = vpop.eup %1965  ;;  %v954_v47 = vmul.f32 1.442695, %v953_v45  ;;  %v1896_v45 = vld [vmem:[%s2620_s2 + $0xd0] sm:$0xff] }
 0x2da   : > { %v801_v48 = vsel %vm794_vm6, %v1966_v46, 0.0  ;;  %1292 = vmatpush.bf16.msrb.mxu2 %v1888_v44 }
 0x2db   : > { %802 = vadd.xlane.f32.xlu1 %v801_v48  ;;  %1967 = vpow2.f32 %v954_v47  ;;  %v1895_v47 = vld [vmem:[%s2620_s2 + $0xc8] sm:$0xff]  ;;  %v1886_v48 = vld [vmem:[%s2620_s2 + $0x80] sm:$0xff] }
 0x2de   : > { %v900_v49 = vpop.xlane.xlu2 %899 }
 0x2df   : > { %v901_v50 = vsub.f32 %v894_v30, %v900_v49  ;;  %v1872_v30 = vld [vmem:[%s2620_s2 + $0x10] sm:$0xff]  ;;  %v1894_v49 = vld [vmem:[%s2620_s2 + $0xc0] sm:$0xff] }
 0x2e0   : > { %1266 = vmatpush.bf16.msrb.mxu0 %v1872_v30 }
 0x2e1   : > { %v1968_v51 = vpop.eup %1967  ;;  %v902_v52 = vmul.f32 1.442695, %v901_v50 }
 0x2e2   : > { %v956_v53 = vsel %vm794_vm6, %v1968_v51, 0.0 }
 0x2e3   : > { %1969 = vpow2.f32 %v902_v52  ;;  %957 = vadd.xlane.f32.xlu2 %v956_v53 }
 0x2e4   : > { %1267 = vmatpush.bf16.msrb.mxu0 %v1871_v34 }
 0x2e8   : > { %1268 = vmatpush.bf16.msrb.mxu0 %v1870_v38 }
 0x2e9   : > { %v1970_v54 = vpop.eup %1969 }
 0x2ea   : > { %v904_v55 = vsel %vm794_vm6, %v1970_v54, 0.0 }
 0x2eb   : > { %905 = vadd.xlane.f32.xlu0 %v904_v55 }
 0x346   : > { %v854_v56 = vpop.xlane.xlu0 %853 }
 0x347   : > { %1971 = vrcp.f32 %v854_v56 }
 0x34d   : > { %v1972_v58 = vpop.eup %1971 }
 0x34e   : > { %v856_v60 = vmul.f32 %v1972_v58, %v1964_v41  ;;  %v803_v61 = vpop.xlane.xlu1 %802  ;;  %v1898_v41 = vld [vmem:[%s2620_s2 + $0xe0] sm:$0xff] }
 0x34f   : > { %1973 = vrcp.f32 %v803_v61 }
 0x350   : > { %v860_v62 = vpack.c.bf16 %v856_v60, %v856_v60 }
 0x352   : > { %1683 = vmatmul.msk.bf16.vlgmr.msrb.gmra.mxu3 %vm794_vm6, %v860_v62 }
 0x353   : > { %1300 = vmatpush.bf16.msrb.mxu3 %v1901_v29  ;;  %v1907_v29 = vld [vmem:[%s2603_s9 + $0x18] sm:$0xff] }
 0x355   : > { %v1974_v1 = vpop.eup %1973 }
 0x356   : > { %v805_v3 = vmul.f32 %v1974_v1, %v1966_v46  ;;  %v958_v4 = vpop.xlane.xlu2 %957  ;;  %v1887_v46 = vld [vmem:[%s2620_s2 + $0x88] sm:$0xff] }
 0x357   : > { %1975 = vrcp.f32 %v958_v4  ;;  %1301 = vmatpush.bf16.msrb.mxu3 %v1900_v33  ;;  %1293 = vmatpush.bf16.msrb.mxu2 %v1887_v46  ;;  %v1905_v46 = vld [vmem:[%s2603_s9 + $0x8] sm:$0xff] }
 0x358   : > { %v807_v6 = vpack.c.bf16 %v805_v3, %v805_v3  ;;  %806 = vst.msk [vmem:[%s2403_s28] sm:$0xff] %vm794_vm6, %v805_v3 }
 0x35a   : > { %1682 = vmatmul.msk.bf16.vlgmr.msrb.gmra.mxu1 %vm794_vm6, %v807_v6 }
 0x35b   : > { %1274 = vmatpush.bf16.msrb.mxu1 %v1885_v5  ;;  %1302 = vmatpush.bf16.msrb.mxu3 %v1899_v37 }
 0x35c   : > { %1294 = vmatpush.bf16.msrb.mxu2 %v1886_v48  ;;  %v1957_v48 = vld [vmem:[%s2602_s8] ss:$0 sm:$0xff] }
 0x35d   : > { %v1976_v9 = vpop.eup %1975 }
 0x35e   : > { %v960_v10 = vmul.f32 %v1976_v9, %v1968_v51  ;;  %v906_v12 = vpop.xlane.xlu0 %905 }
 0x35f   : > { %1275 = vmatpush.bf16.msrb.mxu1 %v1884_v7  ;;  %v857_v14 = vld [vmem:[%s2403_s28] sm:$0xff]  ;;  %1977 = vrcp.f32 %v906_v12  ;;  %1303 = vmatpush.bf16.msrb.mxu3 %v1898_v41 }
 0x360   : > { %v858_v15 = vadd.f32 %v857_v14, %v856_v60  ;;  %v964_v16 = vpack.c.bf16 %v960_v10, %v960_v10 }
 0x362   : > { %859 = vst.msk [vmem:[%s2403_s28] sm:$0xff] %vm794_vm6, %v858_v15  ;;  %1685 = vmatmul.msk.bf16.vlgmr.msra.gmra.mxu3 %vm794_vm6, %v964_v16 }
 0x363   : > { %1276 = vmatpush.bf16.msrb.mxu1 %v1883_v13  ;;  %1304 = vmatpush.bf16.msrb.mxu3 %v1897_v43 }
 0x365   : > { %v1978_v18 = vpop.eup %1977 }
 0x366   : > { %v908_v11 = vmul.f32 %v1978_v18, %v1970_v54 }
 0x367   : > { %1277 = vmatpush.bf16.msrb.mxu1 %v1882_v17  ;;  %1305 = vmatpush.bf16.msrb.mxu3 %v1896_v45 }
 0x368   : > { %v912_v19 = vpack.c.bf16 %v908_v11, %v908_v11 }
 0x369   : > { %v909_v20 = vld [vmem:[%s2403_s28] sm:$0xff] }
 0x36a   : > { %v910_v21 = vadd.f32 %v909_v20, %v908_v11  ;;  %1684 = vmatmul.msk.bf16.vlgmr.msra.gmra.mxu1 %vm794_vm6, %v912_v19 }
 0x36b   : > { %1278 = vmatpush.bf16.msrb.mxu1 %v1881_v27  ;;  %1306 = vmatpush.bf16.msrb.mxu3 %v1895_v47  ;;  %v1904_v47 = vld [vmem:[%s2603_s9] sm:$0xff] }
 0x36c   : > { %911 = vst.msk [vmem:[%s2403_s28] sm:$0xff] %vm794_vm6, %v910_v21 }
 0x36f   : > { %1279 = vmatpush.bf16.msrb.mxu1 %v1880_v31  ;;  %1307 = vmatpush.bf16.msrb.mxu3 %v1894_v49 }
 0x373   : > { %v961_v22 = vld [vmem:[%s2403_s28] sm:$0xff]  ;;  %1280 = vmatpush.bf16.msrb.mxu1 %v1879_v35 }
 0x374   : > { %v962_v23 = vadd.f32 %v961_v22, %v960_v10 }
 0x376   : > { %963 = vst.msk [vmem:[%s2403_s28] sm:$0xff] %vm794_vm6, %v962_v23 }
 0x377   : > { %1281 = vmatpush.bf16.msrb.mxu1 %v1878_v39 }
 0x37b   : > { %1429 = vmatpush.bf16.msra.mxu1 %v1907_v29 }
 0x37d   : > { %v986_v24 = vld [vmem:[%s2403_s28] sm:$0xff] }
 0x37e   : > { %v987_v25 = vmul.f32 0.25, %v986_v24 }
 0x37f   : > { %1430 = vmatpush.bf16.msra.mxu1 %v1906_v32 }
 0x380   : > { %988 = vst.msk [vmem:[%s2403_s28] sm:$0xff] %vm794_vm6, %v987_v25 }
 0x383   : > { %1431 = vmatpush.bf16.msra.mxu1 %v1905_v46 }
 0x387   : > { %1432 = vmatpush.bf16.msra.mxu1 %v1904_v47 }
 0x3d5   : > { %v876_v50 = vpop.f32.mrf.mxu3 }
 0x3d6   : > { %v880_v51 = vpack.c.bf16 %v876_v50, %v876_v50 }
 0x3d7   : > { %v824_v52 = vpop.f32.mrf.mxu1 }
 0x3d8   : > { %881 = vst [vmem:[#allocation3 + $0x4] sm:$0xf] %v880_v51  ;;  %v828_v53 = vpack.c.bf16 %v824_v52, %v824_v52 }
 0x3da   : > { %829 = vst [vmem:[#allocation3] sm:$0xf] %v828_v53 }
 0x3dd   : > { %v878_v54 = vpop.f32.mrf.mxu3 }
 0x3df   : > { %v826_v55 = vpop.f32.mrf.mxu1 }
 0x3e1   : > { %v989_v56 = vld [vmem:[#allocation3] sm:$0xff] }
 0x3e2   : > { %v1057_v57 = vunpack.c.l.b16 %v989_v56  ;;  %v1058_v58 = vunpack.c.h.b16 %v989_v56 }
 0x3e4   : > { %v1061_v59 = vpack.c.b16 %v1057_v57, %v1057_v57  ;;  %v1062_v60 = vpack.c.b16 %v1058_v58, %v1058_v58 }
 0x3e5   : > { %v980_v61 = vpop.f32.mrf.mxu3 }
 0x3e6   : > { %1269 = vmatmul.bf16.vlgmr.msrb.gmra.mxu0 %v1061_v59  ;;  %1282 = vmatmul.bf16.vlgmr.msrb.gmra.mxu1 %v1062_v60  ;;  %v984_v62 = vpack.c.bf16 %v980_v61, %v980_v61 }
 0x3e7   : > { %v928_v63 = vpop.f32.mrf.mxu1 }
 0x3e8   : > { %985 = vst [vmem:[#allocation3 + $0xc] sm:$0xf] %v984_v62  ;;  %v932_v1 = vpack.c.bf16 %v928_v63, %v928_v63 }
 0x3ea   : > { %933 = vst [vmem:[#allocation3 + $0x8] sm:$0xf] %v932_v1 }
 0x3ed   : > { %v982_v2 = vpop.f32.mrf.mxu3 }
 0x3ef   : > { %v930_v3 = vpop.f32.mrf.mxu1 }
 0x3f1   : > { %v990_v4 = vld [vmem:[#allocation3 + $0x8] sm:$0xff] }
 0x3f2   : > { %v1059_v5 = vunpack.c.l.b16 %v990_v4  ;;  %v1060_v6 = vunpack.c.h.b16 %v990_v4 }
 0x3f4   : > { %v1063_v7 = vpack.c.b16 %v1059_v5, %v1059_v5  ;;  %v1064_v9 = vpack.c.b16 %v1060_v6, %v1060_v6 }
 0x3f6   : > { %1295 = vmatmul.bf16.vlgmr.msrb.gmra.mxu2 %v1063_v7  ;;  %1308 = vmatmul.bf16.vlgmr.msrb.gmra.mxu3 %v1064_v9 }
 0x463   : > { %v1270_v10 = vpop.f32.mrf.mxu0  ;;  %v1283_v12 = vpop.f32.mrf.mxu1 }
 0x464   : > { %v1284_v15 = vadd.f32 %v1283_v12, %v1270_v10 }
 0x46b   : > { %v1272_v13 = vpop.f32.mrf.mxu0  ;;  %v1285_v14 = vpop.f32.mrf.mxu1 }
 0x479   : > { %v1296_v16 = vpop.f32.mrf.mxu2  ;;  %v1309_v17 = vpop.f32.mrf.mxu3 }
 0x47a   : > { %v1297_v18 = vadd.f32 %v1296_v16, %v1284_v15 }
 0x47c   : > { %v1310_v11 = vadd.f32 %v1309_v17, %v1297_v18 }
 0x47e   : > { %v2504_v19 = vadd.f32 %v1310_v11, %v2196_v0  ;;  %v1903_v0 = vld [vmem:[%s2601_s7 + $0x8] sm:$0xff] }
 0x47f   : > { %1376 = vmatpush.bf16.msra.mxu0 %v1903_v0 }
 0x480   : > { %v1316_v20 = vsel %vm424_vm0, %v2504_v19, 0.0 }
 0x481   : > { %v1298_v21 = vpop.f32.mrf.mxu2  ;;  %v1311_v22 = vpop.f32.mrf.mxu3  ;;  %1317 = vadd.xlane.f32.xlu1 %v1316_v20 }
 0x483   : > { %1377 = vmatpush.bf16.msra.mxu0 %v1902_v28 }
 0x4f4   : > { %v1318_v23 = vpop.xlane.xlu1 %1317 }
 0x4f5   : > { %v1319_v24 = vmul.f32 %v1318_v23, %v2200_v8 }
 0x4f7   : > { %v1320_v25 = vsub.f32 %v2504_v19, %v1319_v24 }
 0x4f9   : > { %v1321_v26 = vmul.f32 %v1320_v25, %v1320_v25 }
 0x4fb   : > { %v1322_v27 = vsel %vm424_vm0, %v1321_v26, 0.0 }
 0x4fc   : > { %1323 = vadd.xlane.f32.xlu2 %v1322_v27 }
 0x56f   : > { %v1324_v30 = vpop.xlane.xlu2 %1323 }
 0x570   : > { %v1325_v31 = vmul.f32 %v1324_v30, %v2200_v8  ;;  %v1955_v8 = vld [vmem:[%s2599_s5] ss:$0 sm:$0xff] }
 0x572   : > { %v1326_v33 = vadd.f32 1e-05, %v1325_v31 }
 0x574   : > { %1979 = vrsqrt.f32 %v1326_v33  ;;  %vm1333_vm8 = vweird.f32 %v1326_v33 }
 0x57a   : > { %v1980_v34 = vpop.eup %1979 }
 0x57b   : > { %v1328_v35 = vmul.f32 %v1980_v34, %v1326_v33  ;;  %vm1334_vm7 = vweird.f32 %v1980_v34 }
 0x57c   : > { %vm1335_vm9 = vmor %vm1333_vm8, %vm1334_vm7 }
 0x57d   : > { %v1329_v36 = vmul.f32 %v1980_v34, %v1328_v35 }
 0x57f   : > { %v1330_v37 = vmul.f32 0.5, %v1329_v36 }
 0x581   : > { %v1331_v38 = vsub.f32 1.5, %v1330_v37 }
 0x583   : > { %v1332_v39 = vmul.f32 %v1980_v34, %v1331_v38 }
 0x585   : > { %v1336_v40 = vsel %vm1335_vm9, %v1980_v34, %v1332_v39 }
 0x586   : > { %v1337_v41 = vmul.f32 %v1336_v40, %v1320_v25 }
 0x588   : > { %v1341_v43 = vmul.f32 %v1955_v8, %v1337_v41 }
 0x58a   : > { %v1345_v44 = vadd.f32 %v1956_v42, %v1341_v43 }
 0x58c   : > { %v1346_v45 = vpack.c.bf16 %v1345_v44, %v1345_v44 }
 0x58e   : > { %1822 = vmatmul.msk.bf16.vlgmr.msra.gmra.mxu0 %vm424_vm0, %v1346_v45 }
 0x60b   : > { %v1379_v49 = vpop.f32.mrf.mxu0 }
 0x60c   : > { %v1380_v50 = vadd.f32 %v1957_v48, %v1379_v49 }
 0x60e   : > { %v1383_v51 = vmax.f32 %v1380_v50, 0.0 }
 0x610   : > { %v1384_v52 = vpack.c.bf16 %v1383_v51, %v1383_v51 }
 0x612   : > { %1839 = vmatmul.msk.bf16.vlgmr.msra.gmra.mxu1 %vm1421_vm10, %v1384_v52 }
 0x613   : > { %v1381_v53 = vpop.f32.mrf.mxu0 }
 0x614   : > { %2008 = shalt.err (!%p2005_p3)
}
 0x615   : > { %1909 = dma.vmem_to_hbm [thread:$0]  (%p2181_p5), %s1473_s20, 128, %s1475_s26, %s1446_s29   ;;  %v1958_v54 = vld [vmem:[%s2604_s10] ss:$0 sm:$0xff] }
 0x616   : > { %s1456_s17 = scalar_lea.hbm %s2605_s11, %s1842_s18  ;;  %s2621_s3 = sshll.u32 %s2388_s0, 3 }
 0x617   : > { %s408_s4 = scalar_lea.vmem [#allocation4], %s2621_s3  ;;  %s1460_s16 = sshll.u32 %s1456_s17, 4  ;;  %s1461_s16 = int_to_ptr.hbm [resolvable:$true] %s1460_s16 }
 0x618   : > { %s1458_s15 = sshll.u32 %s408_s4, 4  ;;  %s1441_s20 = scalar_lea.sflag [#allocation5], %s2388_s0  ;;  %s1459_s15 = int_to_ptr.vmem [resolvable:$true] %s1458_s15 }
 0x619   : > { %s2023_s26 = sshra.s32 %s1461_s16, 4  ;;  %s2029_s25 = scalar_lea.hbm %s2605_s11, 16  ;;  %s2024_s26 = int_to_ptr.hbm [resolvable:$true] %s2023_s26 }
 0x61a   : > { %s2025_s29 = scalar_lea.hbm %s2024_s26, 8  ;;  %p2030_p9 = scmp.lt.s32.totalorder %s2024_s26, %s2605_s11 }
 0x61b   : > { %p2026_p4 = scmp.ne.s32.totalorder %s2024_s26, %s2025_s29  ;;  %p2031_p10 = scmp.lt.s32.totalorder %s2029_s25, %s2025_s29 }
 0x61d   : > { %p2027_p7 = pnand %p2026_p4, %p2181_p5  ;;  %p2032_p11 = por %p2031_p10, %p2030_p9 }
 0x61f   : > { %p2028_p8 = pneg %p2027_p7 }
 0x621   : > { %p2033_p12 = pnand %p2032_p11, %p2028_p8 }
 0x68f   : > { %v1434_v55 = vpop.f32.mrf.mxu1 }
 0x690   : > { %v1435_v56 = vadd.f32 %v1958_v54, %v1434_v55 }
 0x692   : > { %v1438_v57 = vadd.f32 %v1435_v56, %v2504_v19 }
 0x694   : > { %1439 = vst.msk [vmem:[%s408_s4] sm:$0xff] %vm424_vm0, %v1438_v57 }
 0x695   : > { %2036 = shalt.err (!%p2033_p12)
}
 0x696   : > { %1908 = dma.vmem_to_hbm [thread:$0]  (%p2181_p5), %s1459_s15, 128, %s1461_s16, %s1441_s20  }
 0x697   : > { %v1436_v58 = vpop.f32.mrf.mxu1 }
 0x698 PF: > { %p1919_p13 = scmp.ge.s32.totalorder %s2075_s24, 2  ;;  %s1486_s0 = sand.u32 1, %s2063_s21  }
 0x699   : > { %s1487_s1 = scalar_lea.sflag [#allocation5], %s1486_s0 }
 0x69a   : > { %p1913_p0 = pnand %p1919_p13, %p2185_p6 }
 0x69c   : > { %p1914_p1 = pneg %p1913_p0 }
 0x69e   : > { %2054 = dma.done.wait (%p1914_p1), %s1487_s1, 128  }
 0x69f   : > { %2056 = vsyncadd (%p1914_p1), %s1487_s1, 4294967168  ;;  %s1497_s2 = scalar_lea.sflag [#allocation7], %s1486_s0 }
 0x6a0   : > { %2058 = dma.done.wait (%p1914_p1), %s1497_s2, 128  }
 0x6a1   : > { %2060 = vsyncadd (%p1914_p1), %s1497_s2, 4294967168  ;;  %s2622_s13 = sld [smem:[#allocation10_spill]]  ;;  %p26_p5 = scmp.ge.s32.totalorder %s2168_s27, 4  }
 0x6a2   : > { %s2623_s21 = smov %s2067_s22  ;;  %s2624_s22 = smov %s2071_s23 }
 0x6a3   : > { %s2626_s24 = smov %s2168_s27  ;;  %28 = sbr.rel (!%p26_p5) target bundleno = 11 (0xb), region = 116 }
 0x6a7   : > { %s2625_s23 = smov %s2622_s13 }
 0x6a8   :  { %1503 = vsyncpa [#allocation5], 1 }
 0x6a9   :  { %1505 = vsyncpa [#allocation5 + $0x1], 1 }
 0x6aa   :  { %1506 = vsyncpa [#allocation7], 1 }
 0x6ab   :  { %1508 = vsyncpa [#allocation7 + $0x1], 1 }

</bundles_post_ra>
